<compile_context>
chip_gen: v7x
topology: tpu7x:2x2x1
jax: 0.10.0
libtpu: 0.0.40
codegen_flags: <defaults>
</compile_context>

<pallas_src>
import jax
import jax.numpy as jnp
from jax.experimental import pallas as pl
from jax.experimental.pallas import tpu as pltpu

HIDDEN = 64
IN_DIM = 3
OUT_DIM = 3
G3 = 3 * HIDDEN   # pruned gate rows, order [i, g, o]
G4 = 4 * HIDDEN   # raw PyTorch LSTM gate rows, order [i, f, g, o]


def lstm_pinn_kernel(x_ref, y_ref, t_ref, w0_ref, b0_ref, w1_ref, b1_ref,
                     wfc_ref, bfc_ref, out_ref):
    H = HIDDEN
    x = x_ref[...]          # (1, TB) f32, batch on lanes
    y = y_ref[...]
    t = t_ref[...]

    # ---- LSTM layer 0 (single step, zero state). K == 3 -> three broadcast fmas (VPU). ----
    g0 = (w0_ref[:, 0:1] * x + w0_ref[:, 1:2] * y + w0_ref[:, 2:3] * t) + b0_ref[...]   # (3H, TB)
    # sigmoid(z) = 0.5*tanh(0.5*z) + 0.5; the 0.5 pre-scale is already folded into w0/b0 i,o rows.
    i0 = 0.5 * jnp.tanh(g0[0 * H:1 * H, :]) + 0.5
    gg0 = jnp.tanh(g0[1 * H:2 * H, :])
    o0 = 0.5 * jnp.tanh(g0[2 * H:3 * H, :]) + 0.5
    h0 = o0 * jnp.tanh(i0 * gg0)                                                        # (H, TB)

    # ---- LSTM layer 1: MXU matmul (3H, H) @ (H, TB). ----
    g1 = jnp.dot(w1_ref[...], h0, preferred_element_type=jnp.float32) + b1_ref[...]     # (3H, TB)
    i1 = 0.5 * jnp.tanh(g1[0 * H:1 * H, :]) + 0.5
    gg1 = jnp.tanh(g1[1 * H:2 * H, :])
    o1 = 0.5 * jnp.tanh(g1[2 * H:3 * H, :]) + 0.5
    h1 = o1 * jnp.tanh(i1 * gg1)                                                        # (H, TB)

    # ---- Final linear head: (3, TB) = (3, H) @ (H, TB); lane-dense store. ----
    uvp = jnp.dot(wfc_ref[...], h1, preferred_element_type=jnp.float32) + bfc_ref[...]
    out_ref[...] = uvp.astype(out_ref.dtype)


def _prep_lstm_layer(w_ih, b_ih, b_hh):
    """Drop the f-gate, reorder rows to [i, g, o], fold the sigmoid 0.5 pre-scale into i/o rows."""
    H = HIDDEN
    b = b_ih + b_hh
    w = jnp.concatenate([w_ih[0:H], w_ih[2 * H:3 * H], w_ih[3 * H:4 * H]], axis=0)      # (3H, in)
    b = jnp.concatenate([b[0:H], b[2 * H:3 * H], b[3 * H:4 * H]], axis=0)               # (3H,)
    scale = jnp.concatenate([jnp.full((H,), 0.5, jnp.float32),
                             jnp.ones((H,), jnp.float32),
                             jnp.full((H,), 0.5, jnp.float32)])
    w = (w * scale[:, None]).astype(jnp.float32)
    b = (b * scale).astype(jnp.float32)
    return w, b[:, None]                                                                 # (3H, in), (3H, 1)


def lstm_pinn_ns2d_forward(x, y, t, params, *, batch_tile=1024):
    """x, y, t: [N, 1] float32 arrays. Returns (u, v, p), each [N, 1]."""
    N = x.shape[0]

    # Lane-aligned batch tile; keep the grid at >= 2 parallel steps when N allows it (v7x megacore).
    bt = max(128, int(batch_tile))
    while bt > 128 and pl.cdiv(max(N, 1), bt) < 2:
        bt //= 2
    n_pad = pl.cdiv(N, bt) * bt
    grid = (n_pad // bt,)

    def row(a):  # (N, 1) -> zero-padded (1, n_pad); batch goes on the lane axis
        a = a.astype(jnp.float32)
        if n_pad != N:
            a = jnp.pad(a, ((0, n_pad - N), (0, 0)))
        return a.reshape(1, n_pad)

    w0, b0 = _prep_lstm_layer(params["w_ih_l0"], params["b_ih_l0"], params["b_hh_l0"])
    w1, b1 = _prep_lstm_layer(params["w_ih_l1"], params["b_ih_l1"], params["b_hh_l1"])
    wfc = params["fc_w"].astype(jnp.float32)            # (3, H)
    bfc = params["fc_b"].astype(jnp.float32)[:, None]   # (3, 1)

    # Constant block index -> weights stay resident in VMEM, not re-DMA'd per grid step.
    const = lambda shape: pl.BlockSpec(shape, lambda i: (0, 0))

    uvp_t = pl.pallas_call(
        lstm_pinn_kernel,
        out_shape=jax.ShapeDtypeStruct((OUT_DIM, n_pad), jnp.float32),
        grid_spec=pltpu.PrefetchScalarGridSpec(
            num_scalar_prefetch=0,
            grid=grid,
            in_specs=[
                pl.BlockSpec((1, bt), lambda i: (0, i)),    # x row
                pl.BlockSpec((1, bt), lambda i: (0, i)),    # y row
                pl.BlockSpec((1, bt), lambda i: (0, i)),    # t row
                const((G3, IN_DIM)),                        # w0  (192, 3)
                const((G3, 1)),                             # b0  (192, 1)
                const((G3, HIDDEN)),                        # w1  (192, 64)
                const((G3, 1)),                             # b1  (192, 1)
                const((OUT_DIM, HIDDEN)),                   # wfc (3, 64)
                const((OUT_DIM, 1)),                        # bfc (3, 1)
            ],
            out_specs=pl.BlockSpec((OUT_DIM, bt), lambda i: (0, i)),
        ),
        compiler_params=pltpu.CompilerParams(
            dimension_semantics=("parallel",)),
    )(row(x), row(y), row(t), w0, b0, w1, b1, wfc, bfc)

    u = uvp_t[0, :N].reshape(N, 1)
    v = uvp_t[1, :N].reshape(N, 1)
    p = uvp_t[2, :N].reshape(N, 1)
    return u, v, p


def init_params(key):
    """Deterministic parameter init matching nn.LSTM(3, 64, 2) + nn.Linear(64, 3) shapes."""
    ks = jax.random.split(key, 10)
    s = 0.1
    return {
        # layer 0: input size 3
        "w_ih_l0": s * jax.random.normal(ks[0], (G4, IN_DIM), jnp.float32),
        "w_hh_l0": s * jax.random.normal(ks[1], (G4, HIDDEN), jnp.float32),  # unused (h0 = 0)
        "b_ih_l0": s * jax.random.normal(ks[2], (G4,), jnp.float32),
        "b_hh_l0": s * jax.random.normal(ks[3], (G4,), jnp.float32),
        # layer 1: input size HIDDEN
        "w_ih_l1": s * jax.random.normal(ks[4], (G4, HIDDEN), jnp.float32),
        "w_hh_l1": s * jax.random.normal(ks[5], (G4, HIDDEN), jnp.float32),  # unused (h0 = 0)
        "b_ih_l1": s * jax.random.normal(ks[6], (G4,), jnp.float32),
        "b_hh_l1": s * jax.random.normal(ks[7], (G4,), jnp.float32),
        # final linear
        "fc_w": s * jax.random.normal(ks[8], (OUT_DIM, HIDDEN), jnp.float32),
        "fc_b": s * jax.random.normal(ks[9], (OUT_DIM,), jnp.float32),
    }


def _reference(x, y, t, params):
    """Pure-JAX reference of the full single-step 2-layer LSTM (all 4 gates) + linear head."""
    xyt = jnp.concatenate([x, y, t], axis=-1)
    H = HIDDEN

    def step(inp, w_ih, b_ih, b_hh):
        g = inp @ w_ih.T + b_ih + b_hh          # h_prev = 0 -> W_hh term vanishes
        i = jax.nn.sigmoid(g[:, 0 * H:1 * H])
        f = jax.nn.sigmoid(g[:, 1 * H:2 * H])   # multiplies c_prev = 0
        gg = jnp.tanh(g[:, 2 * H:3 * H])
        o = jax.nn.sigmoid(g[:, 3 * H:4 * H])
        c = f * 0.0 + i * gg
        return o * jnp.tanh(c)

    h0 = step(xyt, params["w_ih_l0"], params["b_ih_l0"], params["b_hh_l0"])
    h1 = step(h0, params["w_ih_l1"], params["b_ih_l1"], params["b_hh_l1"])
    uvp = h1 @ params["fc_w"].T + params["fc_b"]
    return uvp[:, 0:1], uvp[:, 1:2], uvp[:, 2:3]


if __name__ == "__main__":
    key = jax.random.PRNGKey(0)
    kp, kx, ky, kt = jax.random.split(key, 4)

    N = 300  # small batch of collocation points (not a tile multiple -> exercises padding path)
    x = jax.random.uniform(kx, (N, 1), jnp.float32)
    y = jax.random.uniform(ky, (N, 1), jnp.float32)
    t = jax.random.uniform(kt, (N, 1), jnp.float32)

    params = init_params(kp)

    u, v, p = lstm_pinn_ns2d_forward(x, y, t, params)   # auto tile -> bt=128..1024, >=2 grid steps
    jax.block_until_ready((u, v, p))

    u_ref, v_ref, p_ref = _reference(x, y, t, params)
    assert u.shape == (N, 1) and v.shape == (N, 1) and p.shape == (N, 1)
    assert jnp.allclose(u, u_ref, atol=2e-5, rtol=1e-5)
    assert jnp.allclose(v, v_ref, atol=2e-5, rtol=1e-5)
    assert jnp.allclose(p, p_ref, atol=2e-5, rtol=1e-5)

    print("KERNEL_OK")
</pallas_src>

<mosaic_0001>
module attributes {stable_mosaic.version = 11 : i64} {
  func.func @lstm_pinn_kernel(%arg0: i32, %arg1: memref<1x256xf32, #tpu.memory_space<vmem>>, %arg2: memref<1x256xf32, #tpu.memory_space<vmem>>, %arg3: memref<1x256xf32, #tpu.memory_space<vmem>>, %arg4: memref<192x3xf32, #tpu.memory_space<vmem>>, %arg5: memref<192x1xf32, #tpu.memory_space<vmem>>, %arg6: memref<192x64xf32, #tpu.memory_space<vmem>>, %arg7: memref<192x1xf32, #tpu.memory_space<vmem>>, %arg8: memref<3x64xf32, #tpu.memory_space<vmem>>, %arg9: memref<3x1xf32, #tpu.memory_space<vmem>>, %arg10: memref<3x256xf32, #tpu.memory_space<vmem>>) attributes {dimension_semantics = [#tpu.dimension_semantics<parallel>], iteration_bounds = array<i64: 2>, scalar_prefetch = 0 : i64, scratch_operands = 0 : i64, tpu.core_type = #tpu.core_type<tc>, window_params = [{transform_indices = @transform_0, window_bounds = array<i64: 1, 256>}, {transform_indices = @transform_1, window_bounds = array<i64: 1, 256>}, {transform_indices = @transform_2, window_bounds = array<i64: 1, 256>}, {pipeline_mode = #tpu.pipeline_mode<synchronous>, transform_indices = @transform_3, window_bounds = array<i64: 192, 3>}, {pipeline_mode = #tpu.pipeline_mode<synchronous>, transform_indices = @transform_4, window_bounds = array<i64: 192, 1>}, {pipeline_mode = #tpu.pipeline_mode<synchronous>, transform_indices = @transform_5, window_bounds = array<i64: 192, 64>}, {pipeline_mode = #tpu.pipeline_mode<synchronous>, transform_indices = @transform_6, window_bounds = array<i64: 192, 1>}, {pipeline_mode = #tpu.pipeline_mode<synchronous>, transform_indices = @transform_7, window_bounds = array<i64: 3, 64>}, {pipeline_mode = #tpu.pipeline_mode<synchronous>, transform_indices = @transform_8, window_bounds = array<i64: 3, 1>}, {transform_indices = @transform_9, window_bounds = array<i64: 3, 256>}]} {
    %c0 = arith.constant 0 : index
    %c0_0 = arith.constant 0 : index
    %0 = vector.load %arg1[%c0, %c0_0] : memref<1x256xf32, #tpu.memory_space<vmem>>, vector<1x256xf32>
    %c0_1 = arith.constant 0 : index
    %c0_2 = arith.constant 0 : index
    %1 = vector.load %arg2[%c0_1, %c0_2] : memref<1x256xf32, #tpu.memory_space<vmem>>, vector<1x256xf32>
    %c0_3 = arith.constant 0 : index
    %c0_4 = arith.constant 0 : index
    %2 = vector.load %arg3[%c0_3, %c0_4] : memref<1x256xf32, #tpu.memory_space<vmem>>, vector<1x256xf32>
    %c0_5 = arith.constant 0 : index
    %c0_6 = arith.constant 0 : index
    %3 = vector.load %arg4[%c0_5, %c0_6] : memref<192x3xf32, #tpu.memory_space<vmem>>, vector<192x1xf32>
    %4 = vector.broadcast %3 : vector<192x1xf32> to vector<192x256xf32>
    %5 = vector.broadcast %0 : vector<1x256xf32> to vector<192x256xf32>
    %6 = arith.mulf %4, %5 : vector<192x256xf32>
    %c0_7 = arith.constant 0 : index
    %c1 = arith.constant 1 : index
    %7 = vector.load %arg4[%c0_7, %c1] : memref<192x3xf32, #tpu.memory_space<vmem>>, vector<192x1xf32>
    %8 = vector.broadcast %7 : vector<192x1xf32> to vector<192x256xf32>
    %9 = vector.broadcast %1 : vector<1x256xf32> to vector<192x256xf32>
    %10 = arith.mulf %8, %9 : vector<192x256xf32>
    %11 = arith.addf %6, %10 : vector<192x256xf32>
    %c0_8 = arith.constant 0 : index
    %c2 = arith.constant 2 : index
    %12 = vector.load %arg4[%c0_8, %c2] : memref<192x3xf32, #tpu.memory_space<vmem>>, vector<192x1xf32>
    %13 = vector.broadcast %12 : vector<192x1xf32> to vector<192x256xf32>
    %14 = vector.broadcast %2 : vector<1x256xf32> to vector<192x256xf32>
    %15 = arith.mulf %13, %14 : vector<192x256xf32>
    %16 = arith.addf %11, %15 : vector<192x256xf32>
    %c0_9 = arith.constant 0 : index
    %c0_10 = arith.constant 0 : index
    %17 = vector.load %arg5[%c0_9, %c0_10] : memref<192x1xf32, #tpu.memory_space<vmem>>, vector<192x1xf32>
    %18 = vector.broadcast %17 : vector<192x1xf32> to vector<192x256xf32>
    %19 = arith.addf %16, %18 : vector<192x256xf32>
    %20 = vector.extract_strided_slice %19 {offsets = [0, 0], sizes = [64, 256], strides = [1, 1]} : vector<192x256xf32> to vector<64x256xf32>
    %21 = math.tanh %20 : vector<64x256xf32>
    %cst = arith.constant 5.000000e-01 : f32
    %22 = vector.broadcast %cst : f32 to vector<64x256xf32>
    %23 = arith.mulf %22, %21 : vector<64x256xf32>
    %cst_11 = arith.constant 5.000000e-01 : f32
    %24 = vector.broadcast %cst_11 : f32 to vector<64x256xf32>
    %25 = arith.addf %23, %24 : vector<64x256xf32>
    %26 = vector.extract_strided_slice %19 {offsets = [64, 0], sizes = [64, 256], strides = [1, 1]} : vector<192x256xf32> to vector<64x256xf32>
    %27 = math.tanh %26 : vector<64x256xf32>
    %28 = vector.extract_strided_slice %19 {offsets = [128, 0], sizes = [64, 256], strides = [1, 1]} : vector<192x256xf32> to vector<64x256xf32>
    %29 = math.tanh %28 : vector<64x256xf32>
    %cst_12 = arith.constant 5.000000e-01 : f32
    %30 = vector.broadcast %cst_12 : f32 to vector<64x256xf32>
    %31 = arith.mulf %30, %29 : vector<64x256xf32>
    %cst_13 = arith.constant 5.000000e-01 : f32
    %32 = vector.broadcast %cst_13 : f32 to vector<64x256xf32>
    %33 = arith.addf %31, %32 : vector<64x256xf32>
    %34 = arith.mulf %25, %27 : vector<64x256xf32>
    %35 = math.tanh %34 : vector<64x256xf32>
    %36 = arith.mulf %33, %35 : vector<64x256xf32>
    %c0_14 = arith.constant 0 : index
    %c0_15 = arith.constant 0 : index
    %37 = vector.load %arg6[%c0_14, %c0_15] : memref<192x64xf32, #tpu.memory_space<vmem>>, vector<192x64xf32>
    %cst_16 = arith.constant dense<0.000000e+00> : vector<192x256xf32>
    %38 = tpu.matmul %37, %36, %cst_16 {dimension_numbers = #tpu.dot_dimension_numbers<[1], [0], [0], [1], [0, 0, 1, 1], [], []>} : vector<192x64xf32>, vector<64x256xf32>, vector<192x256xf32> -> vector<192x256xf32>
    %c0_17 = arith.constant 0 : index
    %c0_18 = arith.constant 0 : index
    %39 = vector.load %arg7[%c0_17, %c0_18] : memref<192x1xf32, #tpu.memory_space<vmem>>, vector<192x1xf32>
    %40 = vector.broadcast %39 : vector<192x1xf32> to vector<192x256xf32>
    %41 = arith.addf %38, %40 : vector<192x256xf32>
    %42 = vector.extract_strided_slice %41 {offsets = [0, 0], sizes = [64, 256], strides = [1, 1]} : vector<192x256xf32> to vector<64x256xf32>
    %43 = math.tanh %42 : vector<64x256xf32>
    %cst_19 = arith.constant 5.000000e-01 : f32
    %44 = vector.broadcast %cst_19 : f32 to vector<64x256xf32>
    %45 = arith.mulf %44, %43 : vector<64x256xf32>
    %cst_20 = arith.constant 5.000000e-01 : f32
    %46 = vector.broadcast %cst_20 : f32 to vector<64x256xf32>
    %47 = arith.addf %45, %46 : vector<64x256xf32>
    %48 = vector.extract_strided_slice %41 {offsets = [64, 0], sizes = [64, 256], strides = [1, 1]} : vector<192x256xf32> to vector<64x256xf32>
    %49 = math.tanh %48 : vector<64x256xf32>
    %50 = vector.extract_strided_slice %41 {offsets = [128, 0], sizes = [64, 256], strides = [1, 1]} : vector<192x256xf32> to vector<64x256xf32>
    %51 = math.tanh %50 : vector<64x256xf32>
    %cst_21 = arith.constant 5.000000e-01 : f32
    %52 = vector.broadcast %cst_21 : f32 to vector<64x256xf32>
    %53 = arith.mulf %52, %51 : vector<64x256xf32>
    %cst_22 = arith.constant 5.000000e-01 : f32
    %54 = vector.broadcast %cst_22 : f32 to vector<64x256xf32>
    %55 = arith.addf %53, %54 : vector<64x256xf32>
    %56 = arith.mulf %47, %49 : vector<64x256xf32>
    %57 = math.tanh %56 : vector<64x256xf32>
    %58 = arith.mulf %55, %57 : vector<64x256xf32>
    %c0_23 = arith.constant 0 : index
    %c0_24 = arith.constant 0 : index
    %59 = vector.load %arg8[%c0_23, %c0_24] : memref<3x64xf32, #tpu.memory_space<vmem>>, vector<3x64xf32>
    %cst_25 = arith.constant dense<0.000000e+00> : vector<3x256xf32>
    %60 = tpu.matmul %59, %58, %cst_25 {dimension_numbers = #tpu.dot_dimension_numbers<[1], [0], [0], [1], [0, 0, 1, 1], [], []>} : vector<3x64xf32>, vector<64x256xf32>, vector<3x256xf32> -> vector<3x256xf32>
    %c0_26 = arith.constant 0 : index
    %c0_27 = arith.constant 0 : index
    %61 = vector.load %arg9[%c0_26, %c0_27] : memref<3x1xf32, #tpu.memory_space<vmem>>, vector<3x1xf32>
    %62 = vector.broadcast %61 : vector<3x1xf32> to vector<3x256xf32>
    %63 = arith.addf %60, %62 : vector<3x256xf32>
    %c0_28 = arith.constant 0 : index
    %c0_29 = arith.constant 0 : index
    %64 = vector.load %arg10[%c0_28, %c0_29] : memref<3x256xf32, #tpu.memory_space<vmem>>, vector<3x256xf32>
    tpu.vector_store %arg10[%c0_28, %c0_29], %63 {strides = array<i32>} : memref<3x256xf32, #tpu.memory_space<vmem>>, vector<3x256xf32>,
    return
  }
  func.func @transform_0(%arg0: i32) -> (i32, i32) {
    %c0_i32 = arith.constant 0 : i32
    %c0_i32_0 = arith.constant 0 : i32
    return %c0_i32, %arg0 : i32, i32
  }
  func.func @transform_1(%arg0: i32) -> (i32, i32) {
    %c0_i32 = arith.constant 0 : i32
    %c0_i32_0 = arith.constant 0 : i32
    return %c0_i32, %arg0 : i32, i32
  }
  func.func @transform_2(%arg0: i32) -> (i32, i32) {
    %c0_i32 = arith.constant 0 : i32
    %c0_i32_0 = arith.constant 0 : i32
    return %c0_i32, %arg0 : i32, i32
  }
  func.func @transform_3(%arg0: i32) -> (i32, i32) {
    %c0_i32 = arith.constant 0 : i32
    %c0_i32_0 = arith.constant 0 : i32
    %c0_i32_1 = arith.constant 0 : i32
    return %c0_i32, %c0_i32_0 : i32, i32
  }
  func.func @transform_4(%arg0: i32) -> (i32, i32) {
    %c0_i32 = arith.constant 0 : i32
    %c0_i32_0 = arith.constant 0 : i32
    %c0_i32_1 = arith.constant 0 : i32
    return %c0_i32, %c0_i32_0 : i32, i32
  }
  func.func @transform_5(%arg0: i32) -> (i32, i32) {
    %c0_i32 = arith.constant 0 : i32
    %c0_i32_0 = arith.constant 0 : i32
    %c0_i32_1 = arith.constant 0 : i32
    return %c0_i32, %c0_i32_0 : i32, i32
  }
  func.func @transform_6(%arg0: i32) -> (i32, i32) {
    %c0_i32 = arith.constant 0 : i32
    %c0_i32_0 = arith.constant 0 : i32
    %c0_i32_1 = arith.constant 0 : i32
    return %c0_i32, %c0_i32_0 : i32, i32
  }
  func.func @transform_7(%arg0: i32) -> (i32, i32) {
    %c0_i32 = arith.constant 0 : i32
    %c0_i32_0 = arith.constant 0 : i32
    %c0_i32_1 = arith.constant 0 : i32
    return %c0_i32, %c0_i32_0 : i32, i32
  }
  func.func @transform_8(%arg0: i32) -> (i32, i32) {
    %c0_i32 = arith.constant 0 : i32
    %c0_i32_0 = arith.constant 0 : i32
    %c0_i32_1 = arith.constant 0 : i32
    return %c0_i32, %c0_i32_0 : i32, i32
  }
  func.func @transform_9(%arg0: i32) -> (i32, i32) {
    %c0_i32 = arith.constant 0 : i32
    %c0_i32_0 = arith.constant 0 : i32
    return %c0_i32, %arg0 : i32, i32
  }
}

</mosaic_0001>

<bundles_post_ra>
// kernel: tpu_custom_call.1
= control target key start
LH: loop header
LB: loop body
LE: loop exit
PB: predicated region body
PF: predicated region fallthrough
CT: control target
= control target key end

     0   :  { %14 = vsyncpa [#allocation3], 0  ;;  %s3804_s0 = inlined_call_operand.vmem [shape: f32[1,512], index: 0, kind: input, shape index: {}]   ;;  %s3805_s1 = inlined_call_operand.vmem [shape: f32[1,512], index: 1, kind: input, shape index: {}]   ;;  %s3806_s2 = inlined_call_operand.vmem [shape: f32[1,512], index: 2, kind: input, shape index: {}]   ;;  %s3807_s3 = inlined_call_operand.vmem [shape: f32[192,3], index: 3, kind: input, shape index: {}]   ;;  %s3808_s4 = inlined_call_operand.vmem [shape: f32[192,1], index: 4, kind: input, shape index: {}]   ;;  %s3809_s5 = inlined_call_operand.vmem [shape: f32[192,64], index: 5, kind: input, shape index: {}]   ;;  %s3810_s6 = inlined_call_operand.vmem [shape: f32[192,1], index: 6, kind: input, shape index: {}]   ;;  %s3811_s7 = inlined_call_operand.vmem [shape: f32[3,64], index: 7, kind: input, shape index: {}]   ;;  %s3812_s8 = inlined_call_operand.vmem [shape: f32[3,1], index: 8, kind: input, shape index: {}]   ;;  %s3813_s9 = inlined_call_operand.hbm [shape: f32[3,512], index: 9, kind: output, shape index: {}]  }
   0x1   :  { %16 = vsyncpa [#allocation3 + $0x1], 0  ;;  %s2649_s30 = smov 0   ;;  %s2651_s10 = smov 0  }
   0x2   :  { %s2653_s11 = smov 0   ;;  %s2655_s12 = smov 0  }
   0x3 LB: > { %s2670_s13 = sadd.s32 4294967295, %s2592_s12   ;;  %s2118_s14 = sadd.s32 4294967294, %s2592_s12   ;;  %s2592_s12 = sphi %s2655_s12, %s3868_s12   ;;  %s2588_s11 = sphi %s2653_s11, %s3867_s11   ;;  %s2584_s10 = sphi %s2651_s10, %s3866_s10   ;;  %s2580_s30 = sphi %s2649_s30, %s3865_s30  }
   0x4   : > { %s2674_s15 = sadd.s32 1, %s2592_s12   ;;  %s233_s16 = sadd.s32 1, %s2588_s11 }
   0x5   : > { %s230_s17 = ssub.s32 %s2592_s12, %s2674_s15  ;;  %p243_p0 = scmp.ne.s32.totalorder %s2588_s11, %s2584_s10 }
   0x6   : > { %p231_p1 = scmp.eq.s32.totalorder %s230_s17, 0  ;;  %p244_p2 = scmp.eq.s32.totalorder %s2670_s13, 1 }
   0x7   : > { %p249_p3 = scmp.ne.s32.totalorder %s2584_s10, %s2580_s30  ;;  %p250_p4 = scmp.eq.s32.totalorder %s2118_s14, 1 }
   0x8   : > { %s2685_s18 = scalar_select %p231_p1, %s2588_s11, %s233_s16  }
   0x9   : > { %p2687_p5 = por %p244_p2, %p243_p0  ;;  %p2691_p6 = por %p250_p4, %p249_p3 }
   0xa   : > { %p2121_p7 = scmp.ge.s32.totalorder %s2592_s12, 1  ;;  %p310_p8 = scmp.lt.s32.totalorder %s2592_s12, 3 }
   0xc   : > { %p311_p9 = pnand %p2121_p7, %p310_p8 }
   0xe   : > { %314 = sbr.rel (%p311_p9) target bundleno = 983 (0x3d7), region = 56 }
  0x15   : > { %v2700_v0 = vld [vmem:[%s3807_s3] sm:$0xff]  ;;  %v3816_v1 = vmov 1   ;;  %v3818_v2 = vmov 0   ;;  %v373_v3 = vld [vmem:[%s3807_s3 + $0x8] sm:$0xff]  ;;  %v2712_v4 = vld [vmem:[%s3807_s3 + $0x18] sm:$0xff]  ;;  %v3814_v5 = vmov 2  }
  0x16   : > { %2241 = vset.pattern.permute.xlu1 %v3816_v1  ;;  %2240 = vset.pattern.permute.xlu0 %v3818_v2  ;;  %v981_v6 = vld [vmem:[%s3808_s4] sm:$0xff]  ;;  %v374_v7 = vld [vmem:[%s3807_s3 + $0x10] sm:$0xff]  ;;  %v377_v8 = vld [vmem:[%s3807_s3 + $0x28] sm:$0xff]  ;;  %s2123_s29 = sshll.u32 %s2670_s13, 1  ;;  %vm1501_vm0 = vcmask 523264   ;;  %s2156_s26 = sshll.u32 %s2670_s13, 7 }
  0x17   : > { %576 = vperm.xlu1 %2241, %v2700_v0   ;;  %398 = vperm.xlu0 %2240, %v2700_v0   ;;  %v380_v9 = vld [vmem:[%s3807_s3 + $0x40] sm:$0xff]  ;;  %v2732_v10 = vld [vmem:[%s3807_s3 + $0x58] sm:$0xff]  ;;  %v381_v11 = vld [vmem:[%s3807_s3 + $0x48] sm:$0xff]  ;;  %p354_p10 = scmp.lt.s32.totalorder %s2123_s29, 3  ;;  %s3762_s16 = scalar_lea.hbm %s3813_s9, %s2156_s26 }
  0x18   : > { %v984_v12 = vld [vmem:[%s3808_s4 + $0x18] sm:$0xff]  ;;  %v2744_v13 = vld [vmem:[%s3807_s3 + $0x30] sm:$0xff]  ;;  %v2752_v14 = vld [vmem:[%s3807_s3 + $0x60] sm:$0xff]  ;;  %s2598_s13 = smov [#allocation2]  }
  0x19   : > { %v2758_v15 = vld [vmem:[%s3807_s3 + $0x88] sm:$0xff]  ;;  %v2768_v17 = vld [vmem:[%s3807_s3 + $0x78] sm:$0xff]  ;;  %v2774_v18 = vld [vmem:[%s3807_s3 + $0x90] sm:$0xff]  ;;  %s3870_s29 = smov (!%p354_p10, %s2123_s29), 3  ;;  %s2534_s22 = sshll.u32 %s2598_s13, 4  ;;  %s2535_s22 = int_to_ptr.vmem [resolvable:$false] %s2534_s22 }
  0x1a   : > { %v986_v16 = vld [vmem:[%s3808_s4 + $0x28] sm:$0xff]  ;;  %v993_v20 = vld [vmem:[%s3808_s4 + $0x60] sm:$0xff]  ;;  %v382_v23 = vld [vmem:[%s3807_s3 + $0x50] sm:$0xff]  ;;  %s356_s21 = scalar_lea.vmem %s3804_s0, %s3870_s29  ;;  %s361_s24 = scalar_lea.vmem %s3805_s1, %s3870_s29 }
  0x1b   : > { %580 = vperm.xlu1 %2241, %v373_v3   ;;  %403 = vperm.xlu0 %2240, %v373_v3   ;;  %v982_v19 = vld [vmem:[%s3808_s4 + $0x8] sm:$0xff]  ;;  %v376_v21 = vld [vmem:[%s3807_s3 + $0x20] sm:$0xff]  ;;  %v1000_v24 = vld [vmem:[%s3808_s4 + $0x98] sm:$0xff]  ;;  %s366_s27 = scalar_lea.vmem %s3806_s2, %s3870_s29  ;;  %s2536_s23 = scalar_lea.vmem %s2535_s22, 256 }
  0x1c   : > { %v2790_v22 = vld [vmem:[%s3807_s3 + $0xa0] sm:$0xff]  ;;  %v385_v25 = vld [vmem:[%s3807_s3 + $0x68] sm:$0xff]  ;;  %v983_v26 = vld [vmem:[%s3808_s4 + $0x10] sm:$0xff] }
  0x1d   : > { %v989_v27 = vld [vmem:[%s3808_s4 + $0x40] sm:$0xff]  ;;  %v2818_v28 = vld [vmem:[%s3807_s3 + $0xa8] sm:$0xff]  ;;  %v2827_v30 = vld [vmem:[%s3807_s3 + $0xb0] sm:$0xff] }
  0x1e   : > { %v990_v29 = vld [vmem:[%s3808_s4 + $0x48] sm:$0xff]  ;;  %v379_v31 = vld [vmem:[%s3807_s3 + $0x38] sm:$0xff]  ;;  %v388_v32 = vld [vmem:[%s3807_s3 + $0x80] sm:$0xff] }
  0x1f   : > { %2242 = vset.pattern.permute.xlu1 %v3814_v5  ;;  %413 = vperm.xlu0 %2240, %v2712_v4   ;;  %v391_v35 = vld [vmem:[%s3807_s3 + $0x98] sm:$0xff]  ;;  %v985_v38 = vld [vmem:[%s3808_s4 + $0x20] sm:$0xff]  ;;  %v991_v42 = vld [vmem:[%s3808_s4 + $0x50] sm:$0xff] }
  0x20   : > { %783 = vperm.xlu1 %2242, %v373_v3   ;;  %v2869_v40 = vld [vmem:[%s3807_s3 + $0xb8] sm:$0xff]  ;;  %v1003_v44 = vld [vmem:[%s3808_s4 + $0xb0] sm:$0xff]  ;;  %v1358_v48 = vld [vmem:[%s3810_s6 + $0x8] sm:$0xff] }
  0x21   : > { %v992_v46 = vld [vmem:[%s3808_s4 + $0x58] sm:$0xff]  ;;  %v386_v54 = vld [vmem:[%s3807_s3 + $0x70] sm:$0xff]  ;;  %v1366_v55 = vld [vmem:[%s3810_s6 + $0x48] sm:$0xff] }
  0x22   : > { %v1360_v51 = vld [vmem:[%s3810_s6 + $0x18] sm:$0xff]  ;;  %v1362_v58 = vld [vmem:[%s3810_s6 + $0x28] sm:$0xff] }
  0x23   : > { %1007 = vperm.xlu0 %2240, %v981_v6   ;;  %v1368_v61 = vld [vmem:[%s3810_s6 + $0x58] sm:$0xff]  ;;  %v1370_v6 = vld [vmem:[%s3810_s6 + $0x68] sm:$0xff] }
  0x24   : > { %2243 = vset.pattern.permute.xlu1 %v3818_v2 }
  0x25   : > { %408 = vperm.xlu1 %2243, %v374_v7  }
  0x27   : > { %423 = vperm.xlu0 %2240, %v377_v8  }
  0x29   : > { %438 = vperm.xlu1 %2243, %v380_v9  }
  0x2b   : > { %453 = vperm.xlu0 %2240, %v2732_v10  }
  0x2d   : > { %443 = vperm.xlu1 %2243, %v381_v11  }
  0x2f   : > { %1022 = vperm.xlu0 %2240, %v984_v12   ;;  %v1372_v12 = vld [vmem:[%s3810_s6 + $0x78] sm:$0xff] }
  0x31   : > { %2244 = vset.pattern.permute.xlu1 %v3816_v1 }
  0x32   : > { %588 = vperm.xlu1 %2244, %v2712_v4  }
  0x33   : > { %428 = vperm.xlu0 %2240, %v2744_v13  }
  0x36   : > { %608 = vperm.xlu1 %2244, %v380_v9  }
  0x37   : > { %458 = vperm.xlu0 %2240, %v2752_v14  }
  0x3a   : > { %2245 = vset.pattern.permute.xlu1 %v3814_v5 }
  0x3b   : > { %787 = vperm.xlu1 %2245, %v374_v7   ;;  %483 = vperm.xlu0 %2240, %v2758_v15  }
  0x3f   : > { %811 = vperm.xlu1 %2245, %v380_v9   ;;  %1032 = vperm.xlu0 %2240, %v986_v16   ;;  %v1374_v9 = vld [vmem:[%s3810_s6 + $0x88] sm:$0xff]  ;;  %v987_v16 = vld [vmem:[%s3808_s4 + $0x30] sm:$0xff] }
  0x43   : > { %815 = vperm.xlu1 %2245, %v381_v11   ;;  %473 = vperm.xlu0 %2240, %v2768_v17  }
  0x47   : > { %2246 = vset.pattern.permute.xlu1 %v3818_v2  ;;  %488 = vperm.xlu0 %2240, %v2774_v18  }
  0x48   : > { %1012 = vperm.xlu1 %2246, %v982_v19  }
  0x4b   : > { %1067 = vperm.xlu0 %2240, %v993_v20   ;;  %v1378_v20 = vld [vmem:[%s3810_s6 + $0xa8] sm:$0xff] }
  0x4c   : > { %418 = vperm.xlu1 %2246, %v376_v21  }
  0x4f   : > { %498 = vperm.xlu0 %2240, %v2790_v22  }
  0x50   : > { %448 = vperm.xlu1 %2246, %v382_v23  }
  0x53   : > { %1102 = vperm.xlu0 %2240, %v1000_v24  }
  0x54   : > { %2247 = vset.pattern.permute.xlu1 %v3816_v1 }
  0x55   : > { %592 = vperm.xlu1 %2247, %v376_v21  }
  0x57   : > { %2268 = vset.pattern.permute.xlu0 %v3816_v1 }
  0x58   : > { %584 = vperm.xlu0 %2268, %v374_v7  }
  0x59   : > { %616 = vperm.xlu1 %2247, %v382_v23  }
  0x5c   : > { %612 = vperm.xlu0 %2268, %v381_v11  }
  0x5d   : > { %620 = vperm.xlu1 %2247, %v2732_v10  }
  0x60   : > { %596 = vperm.xlu0 %2268, %v377_v8  }
  0x61   : > { %2248 = vset.pattern.permute.xlu1 %v3814_v5 }
  0x62   : > { %799 = vperm.xlu1 %2248, %v377_v8  }
  0x64   : > { %600 = vperm.xlu0 %2268, %v2744_v13  }
  0x66   : > { %819 = vperm.xlu1 %2248, %v382_v23   ;;  %v988_v23 = vld [vmem:[%s3808_s4 + $0x38] sm:$0xff] }
  0x68   : > { %628 = vperm.xlu0 %2268, %v385_v25  }
  0x6a   : > { %2249 = vset.pattern.permute.xlu1 %v3818_v2 }
  0x6b   : > { %1017 = vperm.xlu1 %2249, %v983_v26  }
  0x6c   : > { %648 = vperm.xlu0 %2268, %v2774_v18  }
  0x6f   : > { %1047 = vperm.xlu1 %2249, %v989_v27  }
  0x70   : > { %660 = vperm.xlu0 %2268, %v2818_v28  }
  0x73   : > { %1052 = vperm.xlu1 %2249, %v990_v29   ;;  %v994_v29 = vld [vmem:[%s3808_s4 + $0x68] sm:$0xff] }
  0x74   : > { %664 = vperm.xlu0 %2268, %v2827_v30  }
  0x77   : > { %433 = vperm.xlu1 %2249, %v379_v31  }
  0x78   : > { %2269 = vset.pattern.permute.xlu0 %v3814_v5 }
  0x79   : > { %779 = vperm.xlu0 %2269, %v2700_v0   ;;  %v1364_v0 = vld [vmem:[%s3810_s6 + $0x38] sm:$0xff] }
  0x7b   : > { %463 = vperm.xlu1 %2249, %v385_v25  }
  0x7d   : > { %791 = vperm.xlu0 %2269, %v2712_v4  }
  0x7f   : > { %2250 = vset.pattern.permute.xlu1 %v3816_v1 }
  0x80   : > { %604 = vperm.xlu1 %2250, %v379_v31  }
  0x81   : > { %795 = vperm.xlu0 %2269, %v376_v21   ;;  %v517_v21 = vlaneseq }
  0x83   : > { %v518_v26 = vshrl.u32 %v517_v21, 7 }
  0x84   : > { %624 = vperm.xlu1 %2250, %v2752_v14  }
  0x85   : > { %823 = vperm.xlu0 %2269, %v2732_v10  }
  0x88   : > { %2251 = vset.pattern.permute.xlu1 %v3818_v2 }
  0x89   : > { %478 = vperm.xlu1 %2251, %v388_v32   ;;  %803 = vperm.xlu0 %2269, %v2744_v13  }
  0x8d   : > { %2252 = vset.pattern.permute.xlu1 %v3816_v1  ;;  %831 = vperm.xlu0 %2269, %v385_v25   ;;  %v1380_v25 = vld [vmem:[%s3810_s6 + $0xb8] sm:$0xff] }
  0x8e   : > { %640 = vperm.xlu1 %2252, %v388_v32  }
  0x91   : > { %843 = vperm.xlu0 %2269, %v388_v32   ;;  %v519_v32 = vsub.s32 0, %v518_v26 }
  0x92   : > { %644 = vperm.xlu1 %2252, %v2758_v15  }
  0x95   : > { %839 = vperm.xlu0 %2269, %v2768_v17  }
  0x96   : > { %2253 = vset.pattern.permute.xlu1 %v3814_v5  ;;  %v2848_v33 = vpop.permute.xlu1 %576  ;;  %v2850_v34 = vpop.permute.xlu0 %398 }
  0x97   : > { %807 = vperm.xlu1 %2253, %v379_v31  }
  0x99   : > { %855 = vperm.xlu0 %2269, %v391_v35  }
  0x9a   : > { %v2855_v36 = vpop.permute.xlu1 %580  ;;  %v2857_v37 = vpop.permute.xlu0 %403 }
  0x9b   : > { %827 = vperm.xlu1 %2253, %v2752_v14  }
  0x9d   : > { %859 = vperm.xlu0 %2269, %v2790_v22  }
  0x9e   : > { %v2864_v39 = vpop.permute.xlu0 %413 }
  0x9f   : > { %2254 = vset.pattern.permute.xlu1 %v3818_v2  ;;  %v2872_v41 = vpop.permute.xlu1 %783 }
  0xa0   : > { %1027 = vperm.xlu1 %2254, %v985_v38  }
  0xa1   : > { %871 = vperm.xlu0 %2269, %v2869_v40  }
  0xa2   : > { %v2878_v43 = vpop.permute.xlu0 %1007 }
  0xa4   : > { %1057 = vperm.xlu1 %2254, %v991_v42   ;;  %v2883_v45 = vpop.permute.xlu1 %408  ;;  %v369_v42 = vld [vmem:[%s356_s21] sm:$0x3] }
  0xa5   : > { %2273 = vset.pattern.permute.xlu0 %v3818_v2 }
  0xa6   : > { %v2889_v47 = vpop.permute.xlu0 %423  ;;  %1117 = vperm.xlu0 %2273, %v1003_v44   ;;  %v370_v44 = vld [vmem:[%s361_s24] sm:$0x3]  ;;  %s350_s24 = sand.u32 1, %s2584_s10  }
  0xa7   : > { %s2122_s25 = sshll.u32 %s350_s24, 3  ;;  %s2030_s17 = scalar_lea.sflag [#allocation3], %s350_s24 }
  0xa8   : > { %1062 = vperm.xlu1 %2254, %v992_v46   ;;  %v2894_v49 = vpop.permute.xlu1 %438 }
  0xaa   : > { %v2896_v50 = vpop.permute.xlu0 %453  ;;  %1388 = vperm.xlu0 %2273, %v1358_v48   ;;  %v3009_v48 = vrot.slane %v369_v42, %v519_v32 }
  0xac   : > { %2255 = vset.pattern.permute.xlu1 %v3814_v5  ;;  %v2902_v52 = vpop.permute.xlu1 %443 }
  0xad   : > { %847 = vperm.xlu1 %2255, %v2758_v15   ;;  %v1376_v15 = vld [vmem:[%s3810_s6 + $0x98] sm:$0xff] }
  0xae   : > { %v2905_v53 = vpop.permute.xlu0 %1022  ;;  %1398 = vperm.xlu0 %2273, %v1360_v51  }
  0xb1   : > { %2256 = vset.pattern.permute.xlu1 %v3818_v2  ;;  %v2914_v56 = vpop.permute.xlu1 %588 }
  0xb2   : > { %468 = vperm.xlu1 %2256, %v386_v54   ;;  %v2916_v57 = vpop.permute.xlu0 %428  ;;  %1428 = vperm.xlu0 %2273, %v1366_v55   ;;  %v371_v55 = vld [vmem:[%s366_s27] sm:$0x3]  ;;  %s352_s27 = scalar_lea.vmem [#allocation2], %s2122_s25 }
  0xb3   : > { %v539_v21 = vmul.f32 %v3009_v48, %v2916_v57  ;;  %s2044_s29 = sshll.u32 %s352_s27, 4  ;;  %s3764_s29 = int_to_ptr.vmem [resolvable:$true] %s2044_s29 }
  0xb4   : > { %s2530_s21 = scalar_lea.vmem %s3764_s29, 128  ;;  %p2537_p0 = scmp.lt.s32.totalorder %s3764_s29, %s2535_s22 }
  0xb5   : > { %v2921_v59 = vpop.permute.xlu1 %608  ;;  %p2531_p11 = scmp.ne.s32.totalorder %s3764_s29, %s2530_s21  ;;  %p2538_p1 = scmp.lt.s32.totalorder %s2536_s23, %s2530_s21 }
  0xb6   : > { %2257 = vset.pattern.permute.xlu1 %v3816_v1  ;;  %v2924_v60 = vpop.permute.xlu0 %458  ;;  %1408 = vperm.xlu0 %2273, %v1362_v58   ;;  %v3016_v58 = vrot.slane %v370_v44, %v519_v32 }
  0xb7   : > { %632 = vperm.xlu1 %2257, %v386_v54   ;;  %p2532_p12 = pnand %p2531_p11, %p2687_p5  ;;  %p2539_p2 = por %p2538_p1, %p2537_p0 }
  0xb9   : > { %p2533_p13 = pneg %p2532_p12 }
  0xba   : > { %v2929_v62 = vpop.permute.xlu1 %787  ;;  %v2931_v63 = vpop.permute.xlu0 %483  ;;  %1438 = vperm.xlu0 %2273, %v1368_v61  }
  0xbb   : > { %636 = vperm.xlu1 %2257, %v2768_v17   ;;  %p2540_p3 = pnand %p2539_p2, %p2533_p13 }
  0xbe   : > { %v2937_v3 = vpop.permute.xlu1 %811  ;;  %v2939_v4 = vpop.permute.xlu0 %1032  ;;  %1418 = vperm.xlu0 %2273, %v1364_v0   ;;  %v537_v0 = vmul.f32 %v3009_v48, %v2889_v47 }
  0xbf   : > { %2258 = vset.pattern.permute.xlu1 %v3818_v2 }
  0xc0   : > { %493 = vperm.xlu1 %2258, %v391_v35  }
  0xc2   : > { %v2945_v7 = vpop.permute.xlu1 %815  ;;  %v2947_v8 = vpop.permute.xlu0 %473  ;;  %1448 = vperm.xlu0 %2273, %v1370_v6  }
  0xc3   : > { %3830 = vst [vmem:[#allocation5_spill] sm:$0xff] %v2945_v7 }
  0xc4   : > { %2259 = vset.pattern.permute.xlu1 %v3816_v1 }
  0xc5   : > { %652 = vperm.xlu1 %2259, %v391_v35   ;;  %v523_v35 = vsub.s32 1, %v518_v26 }
  0xc6   : > { %v2953_v10 = vpop.permute.xlu0 %488  ;;  %1468 = vperm.xlu0 %2273, %v1374_v9   ;;  %v997_v9 = vld [vmem:[%s3808_s4 + $0x80] sm:$0xff] }
  0xc7   : > { %3831 = vst [vmem:[#allocation6_spill] sm:$0xff] %v2953_v10  ;;  %v2955_v11 = vpop.permute.xlu1 %1012  ;;  %v3011_v51 = vrot.slane %v369_v42, %v523_v35  ;;  %v3018_v61 = vrot.slane %v370_v44, %v523_v35 }
  0xc8   : > { %3832 = vst [vmem:[#allocation7_spill] sm:$0xff] %v2955_v11 }
  0xc9   : > { %2260 = vset.pattern.permute.xlu1 %v3814_v5  ;;  %v538_v6 = vmul.f32 %v3011_v51, %v2889_v47  ;;  %v540_v47 = vmul.f32 %v3011_v51, %v2916_v57  ;;  %v562_v10 = vmul.f32 %v3011_v51, %v2931_v63 }
  0xca   : > { %835 = vperm.xlu1 %2260, %v386_v54   ;;  %v2961_v13 = vpop.permute.xlu0 %1067  ;;  %1458 = vperm.xlu0 %2273, %v1372_v12  }
  0xcb   : > { %v2964_v14 = vpop.permute.xlu1 %418 }
  0xce   : > { %2261 = vset.pattern.permute.xlu1 %v3818_v2  ;;  %v2973_v17 = vpop.permute.xlu0 %498  ;;  %1478 = vperm.xlu0 %2273, %v1376_v15   ;;  %v3027_v15 = vrot.slane %v371_v55, %v519_v32 }
  0xcf   : > { %3833 = vst [vmem:[#allocation8_spill] sm:$0xff] %v2973_v17  ;;  %1037 = vperm.xlu1 %2261, %v987_v16   ;;  %v2975_v19 = vpop.permute.xlu1 %448  ;;  %v688_v17 = vmul.f32 %v3016_v58, %v2914_v56 }
  0xd2   : > { %v2983_v24 = vpop.permute.xlu0 %1102  ;;  %1488 = vperm.xlu0 %2273, %v1378_v20  }
  0xd3   : > { %3834 = vst [vmem:[#allocation9_spill] sm:$0xff] %v2983_v24  ;;  %1042 = vperm.xlu1 %2261, %v988_v23  }
  0xd4   : > { %v2988_v27 = vpop.permute.xlu1 %592 }
  0xd6   : > { %1498 = vperm.xlu0 %2273, %v1380_v25  }
  0xd7   : > { %1072 = vperm.xlu1 %2261, %v994_v29   ;;  %v2996_v31 = vpop.permute.xlu0 %584 }
  0xd8   : > { %v3001_v38 = vpop.permute.xlu1 %616 }
  0xdb   : > { %2262 = vset.pattern.permute.xlu1 %v3814_v5  ;;  %v3007_v46 = vpop.permute.xlu0 %612 }
  0xdc   : > { %851 = vperm.xlu1 %2262, %v2774_v18   ;;  %v3014_v54 = vpop.permute.xlu1 %620  ;;  %v3029_v18 = vrot.slane %v371_v55, %v523_v35  ;;  %v998_v35 = vld [vmem:[%s3808_s4 + $0x88] sm:$0xff] }
  0xdf   : > { %v597_v12 = vpop.permute.xlu0 %596 }
  0xe0   : > { %v692_v16 = vmul.f32 %v3016_v58, %v597_v12  ;;  %v693_v20 = vmul.f32 %v3018_v61, %v597_v12  ;;  %2263 = vset.pattern.permute.xlu1 %v3818_v2 }
  0xe1   : > { %1087 = vperm.xlu1 %2263, %v997_v9   ;;  %v800_v23 = vpop.permute.xlu1 %799 }
  0xe2   : > { %v740_v25 = vadd.f32 %v692_v16, %v537_v0  ;;  %v741_v26 = vadd.f32 %v693_v20, %v538_v6  ;;  %v895_v29 = vmul.f32 %v3027_v15, %v800_v23  ;;  %v896_v32 = vmul.f32 %v3029_v18, %v800_v23 }
  0xe3   : > { %v601_v42 = vpop.permute.xlu0 %600 }
  0xe4   : > { %v943_v44 = vadd.f32 %v895_v29, %v740_v25  ;;  %v944_v55 = vadd.f32 %v896_v32, %v741_v26  ;;  %v694_v12 = vmul.f32 %v3016_v58, %v601_v42  ;;  %v695_v5 = vmul.f32 %v3018_v61, %v601_v42  ;;  %v995_v25 = vld [vmem:[%s3808_s4 + $0x70] sm:$0xff] }
  0xe5   : > { %1092 = vperm.xlu1 %2263, %v998_v35   ;;  %v3045_v57 = vpop.permute.xlu1 %819  ;;  %v3840_v29 = vmov 2   ;;  %v999_v32 = vld [vmem:[%s3808_s4 + $0x90] sm:$0xff] }
  0xe6   : > { %v3048_v0 = vadd.f32 %v2939_v4, %v943_v44  ;;  %v3051_v6 = vadd.f32 %v2939_v4, %v944_v55  ;;  %v3053_v9 = vadd.f32 %v694_v12, %v539_v21  ;;  %v3055_v16 = vadd.f32 %v695_v5, %v540_v47  ;;  %v996_v21 = vld [vmem:[%s3808_s4 + $0x78] sm:$0xff] }
  0xe7   : > { %v3070_v5 = vpop.permute.xlu0 %628  ;;  %v551_v44 = vmul.f32 %v3009_v48, %v2924_v60  ;;  %v552_v55 = vmul.f32 %v3011_v51, %v2924_v60  ;;  %v533_v60 = vmul.f32 %v3009_v48, %v2864_v39 }
  0xe8   : > { %3835 = vst [vmem:[#allocation10_spill] sm:$0xff] %v3048_v0  ;;  %3836 = vst [vmem:[#allocation11_spill] sm:$0xff] %v3051_v6 }
  0xe9   : > { %503 = vperm.xlu1 %2263, %v2818_v28  }
  0xea   : > { %v3058_v20 = vpop.permute.xlu1 %1017 }
  0xed   : > { %2264 = vset.pattern.permute.xlu1 %v3816_v1 }
  0xee   : > { %656 = vperm.xlu1 %2264, %v2790_v22   ;;  %v3062_v23 = vpop.permute.xlu1 %1047  ;;  %v3075_v22 = vpop.permute.xlu0 %648 }
  0xef   : > { %3837 = vst [vmem:[#allocation12_spill] sm:$0xff] %v3062_v23  ;;  %3839 = vst [vmem:[#allocation14_spill] sm:$0xff] %v3075_v22  ;;  %v689_v22 = vmul.f32 %v3018_v61, %v2914_v56  ;;  %v3133_v56 = vmul.f32 %v3009_v48, %v2896_v50 }
  0xf2   : > { %2265 = vset.pattern.permute.xlu1 %v3818_v2  ;;  %v3068_v4 = vpop.permute.xlu1 %1052  ;;  %v3084_v35 = vpop.permute.xlu0 %660 }
  0xf3   : > { %3838 = vst [vmem:[#allocation13_spill] sm:$0xff] %v3068_v4  ;;  %1077 = vperm.xlu1 %2265, %v995_v25   ;;  %3841 = vst [vmem:[#allocation15_spill] sm:$0xff] %v3084_v35 }
  0xf6   : > { %v434_v47 = vpop.permute.xlu1 %433 }
  0xf7   : > { %1082 = vperm.xlu1 %2265, %v996_v21   ;;  %v3093_v21 = vpop.permute.xlu0 %664 }
  0xf8   : > { %3842 = vst [vmem:[#allocation16_spill] sm:$0xff] %v3093_v21 }
  0xfa   : > { %v3077_v26 = vpop.permute.xlu1 %463 }
  0xfb   : > { %2266 = vset.pattern.permute.xlu1 %v3840_v29 }
  0xfc   : > { %863 = vperm.xlu1 %2266, %v2818_v28  }
  0xff   : > { %v605_v42 = vpop.permute.xlu1 %604 }
 0x100   : > { %2267 = vset.pattern.permute.xlu1 %v3818_v2  ;;  %v3101_v2 = vpop.permute.xlu0 %779 }
 0x101   : > { %1097 = vperm.xlu1 %2267, %v999_v32  }
 0x103   : > { %v625_v12 = vpop.permute.xlu1 %624 }
 0x104   : > { %v706_v25 = vmul.f32 %v3016_v58, %v625_v12  ;;  %v707_v28 = vmul.f32 %v3018_v61, %v625_v12  ;;  %v3843_v12 = vmov 1   ;;  %v792_v23 = vpop.permute.xlu0 %791 }
 0x105   : > { %508 = vperm.xlu1 %2267, %v2827_v30  }
 0x106   : > { %v3096_v1 = vadd.f32 %v706_v25, %v551_v44  ;;  %v3098_v35 = vadd.f32 %v707_v28, %v552_v55  ;;  %v534_v28 = vmul.f32 %v3011_v51, %v2864_v39  ;;  %v532_v39 = vmul.f32 %v3011_v51, %v2883_v45 }
 0x108   : > { %v479_v32 = vpop.permute.xlu1 %478 }
 0x109   : > { %513 = vperm.xlu1 %2267, %v2869_v40   ;;  %v559_v24 = vmul.f32 %v3009_v48, %v479_v32  ;;  %v560_v44 = vmul.f32 %v3011_v51, %v479_v32  ;;  %v686_v32 = vmul.f32 %v3016_v58, %v2996_v31 }
 0x10d   : > { %2270 = vset.pattern.permute.xlu1 %v3843_v12  ;;  %v641_v21 = vpop.permute.xlu1 %640  ;;  %v561_v12 = vmul.f32 %v3009_v48, %v2931_v63  ;;  %v687_v63 = vmul.f32 %v3018_v61, %v2996_v31  ;;  %v697_v31 = vmul.f32 %v3018_v61, %v605_v42 }
 0x10e   : > { %v714_v55 = vmul.f32 %v3016_v58, %v641_v21  ;;  %v715_v25 = vmul.f32 %v3018_v61, %v641_v21  ;;  %668 = vperm.xlu1 %2270, %v2869_v40   ;;  %v531_v40 = vmul.f32 %v3009_v48, %v2883_v45  ;;  %v737_v45 = vadd.f32 %v689_v22, %v534_v28 }
 0x10f   : > { %v541_v22 = vmul.f32 %v3009_v48, %v434_v47  ;;  %v891_v28 = vmul.f32 %v3027_v15, %v792_v23 }
 0x110   : > { %v3123_v4 = vadd.f32 %v714_v55, %v559_v24  ;;  %v3125_v21 = vadd.f32 %v715_v25, %v560_v44  ;;  %v3139_v24 = vmul.f32 %v3011_v51, %v2896_v50  ;;  %v736_v44 = vadd.f32 %v688_v17, %v533_v60 }
 0x111   : > { %v645_v6 = vpop.permute.xlu1 %644  ;;  %v890_v50 = vmul.f32 %v3029_v18, %v2929_v62  ;;  %v734_v17 = vadd.f32 %v686_v32, %v531_v40 }
 0x112   : > { %3844 = vst [vmem:[#allocation17_spill] sm:$0xff] %v3123_v4  ;;  %3845 = vst [vmem:[#allocation18_spill] sm:$0xff] %v3125_v21  ;;  %v716_v55 = vmul.f32 %v3016_v58, %v645_v6  ;;  %v717_v25 = vmul.f32 %v3018_v61, %v645_v6  ;;  %2271 = vset.pattern.permute.xlu1 %v3840_v29  ;;  %v889_v21 = vmul.f32 %v3027_v15, %v2929_v62 }
 0x113   : > { %v696_v4 = vmul.f32 %v3016_v58, %v605_v42  ;;  %867 = vperm.xlu1 %2271, %v2827_v30   ;;  %v735_v6 = vadd.f32 %v687_v63, %v532_v39  ;;  %v542_v29 = vmul.f32 %v3011_v51, %v434_v47  ;;  %v1001_v42 = vld [vmem:[%s3808_s4 + $0xa0] sm:$0xff]  ;;  %v535_v30 = vmul.f32 %v3009_v48, %v2964_v14  ;;  %v796_v39 = vpop.permute.xlu0 %795 }
 0x114   : > { %v3151_v60 = vadd.f32 %v716_v55, %v561_v12  ;;  %v3153_v0 = vadd.f32 %v717_v25, %v562_v10  ;;  %v536_v62 = vmul.f32 %v3011_v51, %v2964_v14  ;;  %v547_v10 = vmul.f32 %v3009_v48, %v2975_v19 }
 0x115   : > { %v892_v12 = vmul.f32 %v3029_v18, %v792_v23  ;;  %v744_v40 = vadd.f32 %v696_v4, %v541_v22  ;;  %v745_v47 = vadd.f32 %v697_v31, %v542_v29  ;;  %v3848_v25 = vmov 0   ;;  %v1002_v22 = vld [vmem:[%s3808_s4 + $0xa8] sm:$0xff] }
 0x116   : > { %3846 = vst [vmem:[#allocation19_spill] sm:$0xff] %v3151_v60  ;;  %3847 = vst [vmem:[#allocation20_spill] sm:$0xff] %v3153_v0  ;;  %v808_v32 = vpop.permute.xlu1 %807  ;;  %v548_v0 = vmul.f32 %v3011_v51, %v2975_v19  ;;  %v690_v14 = vmul.f32 %v3016_v58, %v2988_v27  ;;  %v691_v60 = vmul.f32 %v3018_v61, %v2988_v27 }
 0x117   : > { %v899_v63 = vmul.f32 %v3027_v15, %v808_v32  ;;  %v900_v55 = vmul.f32 %v3029_v18, %v808_v32  ;;  %2272 = vset.pattern.permute.xlu1 %v3848_v25  ;;  %v937_v23 = vadd.f32 %v889_v21, %v734_v17  ;;  %v938_v4 = vadd.f32 %v890_v50, %v735_v6 }
 0x118   : > { %1107 = vperm.xlu1 %2272, %v1001_v42   ;;  %v939_v31 = vadd.f32 %v891_v28, %v736_v44  ;;  %v940_v25 = vadd.f32 %v892_v12, %v737_v45  ;;  %v893_v11 = vmul.f32 %v3027_v15, %v796_v39  ;;  %v894_v7 = vmul.f32 %v3029_v18, %v796_v39 }
 0x119   : > { %v3180_v29 = vadd.f32 %v899_v63, %v744_v40  ;;  %v3182_v32 = vadd.f32 %v900_v55, %v745_v47  ;;  %v1129_v19 = vadd.f32 %v3058_v20, %v937_v23  ;;  %v702_v21 = vmul.f32 %v3016_v58, %v3001_v38 }
 0x11a   : > { %v828_v27 = vpop.permute.xlu1 %827  ;;  %v1130_v44 = vadd.f32 %v3058_v20, %v938_v4  ;;  %v738_v6 = vadd.f32 %v690_v14, %v535_v30  ;;  %v739_v28 = vadd.f32 %v691_v60, %v536_v62  ;;  %v703_v42 = vmul.f32 %v3018_v61, %v3001_v38  ;;  %v1004_v60 = vld [vmem:[%s3808_s4 + $0xb8] sm:$0xff] }
 0x11b   : > { %v909_v50 = vmul.f32 %v3027_v15, %v828_v27  ;;  %v910_v17 = vmul.f32 %v3029_v18, %v828_v27  ;;  %v905_v45 = vmul.f32 %v3027_v15, %v3045_v57  ;;  %v906_v12 = vmul.f32 %v3029_v18, %v3045_v57 }
 0x11c   : > { %1112 = vperm.xlu1 %2272, %v1002_v22   ;;  %v1131_v40 = vadd.f32 %v2905_v53, %v939_v31  ;;  %2274 = vtanh.f32 %v1129_v19  ;;  %v1132_v38 = vadd.f32 %v2905_v53, %v940_v25  ;;  %v941_v30 = vadd.f32 %v893_v11, %v738_v6 }
 0x11d   : > { %v957_v20 = vadd.f32 %v909_v50, %v3096_v1  ;;  %v958_v47 = vadd.f32 %v910_v17, %v3098_v35  ;;  %v942_v62 = vadd.f32 %v894_v7, %v739_v28  ;;  %v750_v39 = vadd.f32 %v702_v21, %v547_v10  ;;  %v824_v1 = vpop.permute.xlu0 %823  ;;  %v1357_v7 = vld [vmem:[%s3810_s6] sm:$0xff]  ;;  %v1359_v21 = vld [vmem:[%s3810_s6 + $0x10] sm:$0xff] }
 0x11e   : > { %v704_v63 = vmul.f32 %v3016_v58, %v3014_v54  ;;  %v705_v57 = vmul.f32 %v3018_v61, %v3014_v54  ;;  %2276 = vtanh.f32 %v1130_v44  ;;  %v751_v35 = vadd.f32 %v703_v42, %v548_v0  ;;  %v1365_v28 = vld [vmem:[%s3810_s6 + $0x40] sm:$0xff] }
 0x11f   : > { %v1028_v55 = vpop.permute.xlu1 %1027  ;;  %2278 = vtanh.f32 %v1131_v40  ;;  %v1149_v4 = vadd.f32 %v2961_v13, %v957_v20  ;;  %v953_v53 = vadd.f32 %v905_v45, %v750_v39  ;;  %v907_v11 = vmul.f32 %v3027_v15, %v824_v1 }
 0x120   : > { %v1133_v14 = vadd.f32 %v1028_v55, %v941_v30  ;;  %v1134_v23 = vadd.f32 %v1028_v55, %v942_v62  ;;  %1122 = vperm.xlu1 %2272, %v1004_v60   ;;  %2280 = vtanh.f32 %v1132_v38  ;;  %v908_v54 = vmul.f32 %v3029_v18, %v824_v1  ;;  %v1361_v60 = vld [vmem:[%s3810_s6 + $0x20] sm:$0xff] }
 0x121   : > { %v954_v10 = vadd.f32 %v906_v12, %v751_v35  ;;  %v752_v31 = vadd.f32 %v704_v63, %v3133_v56  ;;  %v753_v0 = vadd.f32 %v705_v57, %v3139_v24  ;;  %v1150_v19 = vadd.f32 %v2961_v13, %v958_v47 }
 0x122   : > { %2282 = vtanh.f32 %v1133_v14 }
 0x123   : > { %v1058_v22 = vpop.permute.xlu1 %1057  ;;  %2284 = vtanh.f32 %v1134_v23  ;;  %v955_v44 = vadd.f32 %v907_v11, %v752_v31  ;;  %v956_v50 = vadd.f32 %v908_v54, %v753_v0  ;;  %v1367_v11 = vld [vmem:[%s3810_s6 + $0x50] sm:$0xff] }
 0x124   : > { %v1145_v25 = vadd.f32 %v1058_v22, %v953_v53  ;;  %v1146_v27 = vadd.f32 %v1058_v22, %v954_v10  ;;  %1383 = vperm.xlu1 %2272, %v1357_v7   ;;  %2286 = vtanh.f32 %v1149_v4 }
 0x126   : > { %2288 = vtanh.f32 %v1145_v25  ;;  %v2275_v17 = vpop.eup %2274 }
 0x127   : > { %2290 = vtanh.f32 %v1146_v27  ;;  %v1063_v56 = vpop.permute.xlu1 %1062  ;;  %v1193_v45 = vmul.f32 0.5, %v2275_v17 }
 0x128   : > { %2292 = vtanh.f32 %v1150_v19  ;;  %v1147_v24 = vadd.f32 %v1063_v56, %v955_v44  ;;  %v1148_v6 = vadd.f32 %v1063_v56, %v956_v50  ;;  %1393 = vperm.xlu1 %2272, %v1359_v21   ;;  %v2277_v13 = vpop.eup %2276  ;;  %v1363_v44 = vld [vmem:[%s3810_s6 + $0x30] sm:$0xff] }
 0x129   : > { %v2279_v42 = vpop.eup %2278  ;;  %v1194_v40 = vmul.f32 0.5, %v2277_v13  ;;  %v1209_v39 = vadd.f32 0.5, %v1193_v45 }
 0x12a   : > { %2294 = vtanh.f32 %v1147_v24  ;;  %v2281_v12 = vpop.eup %2280  ;;  %v1195_v63 = vmul.f32 0.5, %v2279_v42 }
 0x12b   : > { %2296 = vtanh.f32 %v1148_v6  ;;  %v1210_v55 = vadd.f32 0.5, %v1194_v40  ;;  %v1196_v35 = vmul.f32 0.5, %v2281_v12  ;;  %v1369_v12 = vld [vmem:[%s3810_s6 + $0x60] sm:$0xff] }
 0x12c   : > { %1423 = vperm.xlu1 %2272, %v1365_v28   ;;  %v3224_v20 = vpop.permute.xlu1 %847  ;;  %v2283_v47 = vpop.eup %2282  ;;  %v1211_v0 = vadd.f32 0.5, %v1195_v63  ;;  %v2597_v28 = vmov 0.0   ;;  %v1373_v63 = vld [vmem:[%s3810_s6 + $0x80] sm:$0xff] }
 0x12d   : > { %v2285_v38 = vpop.eup %2284  ;;  %v1197_v30 = vmul.f32 0.5, %v2283_v47  ;;  %v1212_v25 = vadd.f32 0.5, %v1196_v35  ;;  %1638 = vmatprep.mubr.f32.mxu0 %v2597_v28  ;;  %1716 = vmatprep.mubr.f32.mxu1 %v2597_v28  ;;  %v557_v47 = vmul.f32 %v3009_v48, %v2947_v8 }
 0x12e   : > { %v2287_v62 = vpop.eup %2286  ;;  %v1198_v57 = vmul.f32 0.5, %v2285_v38 }
 0x12f   : > { %v1213_v14 = vadd.f32 0.5, %v1197_v30 }
 0x130   : > { %v2289_v1 = vpop.eup %2288  ;;  %1403 = vperm.xlu1 %2272, %v1361_v60   ;;  %v1214_v4 = vadd.f32 0.5, %v1198_v57  ;;  %v558_v60 = vmul.f32 %v3011_v51, %v2947_v8  ;;  %v682_v57 = vmul.f32 %v3016_v58, %v2848_v33  ;;  %v683_v8 = vmul.f32 %v3018_v61, %v2848_v33 }
 0x131   : > { %v2291_v23 = vpop.eup %2290  ;;  %v3229_v53 = vmul.f32 %v2289_v1, %v1209_v39  ;;  %v469_v7 = vpop.permute.xlu1 %468  ;;  %v3234_v10 = vmul.f32 %v2287_v62, %v1213_v14  ;;  %v527_v1 = vmul.f32 %v3009_v48, %v2850_v34  ;;  %v885_v14 = vmul.f32 %v3027_v15, %v3101_v2 }
 0x132   : > { %v2293_v54 = vpop.eup %2292  ;;  %v3236_v31 = vmul.f32 %v2291_v23, %v1210_v55  ;;  %v555_v56 = vmul.f32 %v3009_v48, %v469_v7  ;;  %v556_v24 = vmul.f32 %v3011_v51, %v469_v7  ;;  %v528_v55 = vmul.f32 %v3011_v51, %v2850_v34 }
 0x133   : > { %v3238_v22 = vmul.f32 %v2293_v54, %v1214_v4  ;;  %v886_v23 = vmul.f32 %v3029_v18, %v3101_v2  ;;  %v1371_v4 = vld [vmem:[%s3810_s6 + $0x70] sm:$0xff]  ;;  %v730_v7 = vadd.f32 %v682_v57, %v527_v1  ;;  %v684_v33 = vmul.f32 %v3016_v58, %v2855_v36 }
 0x134   : > { %v2295_v19 = vpop.eup %2294  ;;  %1433 = vperm.xlu1 %2272, %v1367_v11   ;;  %v529_v34 = vmul.f32 %v3009_v48, %v2857_v37  ;;  %v731_v11 = vadd.f32 %v683_v8, %v528_v55  ;;  %v685_v54 = vmul.f32 %v3018_v61, %v2855_v36  ;;  %v887_v2 = vmul.f32 %v3027_v15, %v2872_v41 }
 0x135   : > { %v2297_v27 = vpop.eup %2296  ;;  %v3240_v21 = vmul.f32 %v2295_v19, %v1211_v0  ;;  %v530_v0 = vmul.f32 %v3011_v51, %v2857_v37  ;;  %v933_v19 = vadd.f32 %v885_v14, %v730_v7  ;;  %v888_v37 = vmul.f32 %v3029_v18, %v2872_v41 }
 0x136   : > { %v3245_v50 = vmul.f32 %v2297_v27, %v1212_v25  ;;  %v633_v17 = vpop.permute.xlu1 %632  ;;  %v698_v27 = vmul.f32 %v3016_v58, %v2921_v59  ;;  %v701_v1 = vmul.f32 %v3018_v61, %v3007_v46  ;;  %v546_v14 = vmul.f32 %v3011_v51, %v2902_v52 }
 0x137   : > { %v710_v6 = vmul.f32 %v3016_v58, %v633_v17  ;;  %v711_v13 = vmul.f32 %v3018_v61, %v633_v17  ;;  %v732_v17 = vadd.f32 %v684_v33, %v529_v34  ;;  %v733_v36 = vadd.f32 %v685_v54, %v530_v0 }
 0x138   : > { %1413 = vperm.xlu1 %2272, %v1363_v44   ;;  %v934_v44 = vadd.f32 %v886_v23, %v731_v11  ;;  %v700_v34 = vmul.f32 %v3016_v58, %v3007_v46  ;;  %v749_v0 = vadd.f32 %v701_v1, %v546_v14  ;;  %v553_v46 = vmul.f32 %v3009_v48, %v3077_v26 }
 0x139   : > { %v3252_v42 = vadd.f32 %v710_v6, %v555_v56  ;;  %v3254_v45 = vadd.f32 %v711_v13, %v556_v24  ;;  %v1375_v56 = vld [vmem:[%s3810_s6 + $0x90] sm:$0xff]  ;;  %v543_v24 = vmul.f32 %v3009_v48, %v2894_v49  ;;  %v699_v6 = vmul.f32 %v3018_v61, %v2921_v59 }
 0x13a   : > { %v637_v40 = vpop.permute.xlu1 %636  ;;  %v544_v13 = vmul.f32 %v3011_v51, %v2894_v49  ;;  %v1126_v41 = vadd.f32 %v2878_v43, %v934_v44  ;;  %v1377_v49 = vld [vmem:[%s3810_s6 + $0xa0] sm:$0xff]  ;;  %v902_v59 = vmul.f32 %v3029_v18, %v2937_v3 }
 0x13b   : > { %v712_v38 = vmul.f32 %v3016_v58, %v637_v40  ;;  %v713_v30 = vmul.f32 %v3018_v61, %v637_v40  ;;  %v935_v40 = vadd.f32 %v887_v2, %v732_v17 }
 0x13c   : > { %1443 = vperm.xlu1 %2272, %v1369_v12   ;;  %v901_v12 = vmul.f32 %v3027_v15, %v2937_v3  ;;  %v747_v23 = vadd.f32 %v699_v6, %v544_v13  ;;  %v3852_v13 = vld [vmem:[#allocation11_spill] sm:$0xff] }
 0x13d   : > { %v3266_v62 = vadd.f32 %v712_v38, %v557_v47  ;;  %v3268_v39 = vadd.f32 %v713_v30, %v558_v60  ;;  %v1125_v47 = vadd.f32 %v2878_v43, %v933_v19  ;;  %v804_v60 = vpop.permute.xlu0 %803  ;;  %v746_v38 = vadd.f32 %v698_v27, %v543_v24  ;;  %v3851_v24 = vld [vmem:[#allocation10_spill] sm:$0xff] }
 0x13e   : > { %v897_v30 = vmul.f32 %v3027_v15, %v804_v60  ;;  %v545_v43 = vmul.f32 %v3009_v48, %v2902_v52  ;;  %v1379_v52 = vld [vmem:[%s3810_s6 + $0xb0] sm:$0xff]  ;;  %v950_v2 = vadd.f32 %v902_v59, %v747_v23 }
 0x13f   : > { %v3281_v35 = vpop.permute.xlu1 %493  ;;  %v949_v7 = vadd.f32 %v901_v12, %v746_v38  ;;  %2298 = vtanh.f32 %v1125_v47  ;;  %v1944_v47 = vld [vmem:[%s3812_s8] sm:$0x7]  ;;  %v3854_v59 = vld [vmem:[#allocation13_spill] sm:$0xff] }
 0x140   : > { %1463 = vperm.xlu1 %2272, %v1373_v63   ;;  %v898_v63 = vmul.f32 %v3029_v18, %v804_v60  ;;  %2300 = vtanh.f32 %v1126_v41  ;;  %v945_v11 = vadd.f32 %v897_v30, %v3053_v9  ;;  %v554_v9 = vmul.f32 %v3011_v51, %v3077_v26  ;;  %v3853_v60 = vld [vmem:[#allocation12_spill] sm:$0xff] }
 0x141   : > { %v832_v19 = vpop.permute.xlu0 %831  ;;  %2302 = vtanh.f32 %v3851_v24  ;;  %v748_v6 = vadd.f32 %v700_v34, %v545_v43  ;;  %v1141_v38 = vadd.f32 %v3853_v60, %v949_v7  ;;  %v920_v24 = vmul.f32 %v3029_v18, %v3224_v20 }
 0x142   : > { %v946_v54 = vadd.f32 %v898_v63, %v3055_v16  ;;  %2304 = vtanh.f32 %v3852_v13  ;;  %v911_v12 = vmul.f32 %v3027_v15, %v832_v19  ;;  %v912_v26 = vmul.f32 %v3029_v18, %v832_v19 }
 0x143   : > { %v1142_v63 = vadd.f32 %v3853_v60, %v950_v2 }
 0x144   : > { %1453 = vperm.xlu1 %2272, %v1371_v4   ;;  %v3300_v25 = vpop.permute.xlu1 %652  ;;  %v936_v4 = vadd.f32 %v888_v37, %v733_v36  ;;  %v3850_v36 = vld [vmem:[#allocation7_spill] sm:$0xff] }
 0x145   : > { %v1127_v37 = vadd.f32 %v3850_v36, %v935_v40 }
 0x148   : > { %1473 = vperm.xlu1 %2272, %v1375_v56   ;;  %v3849_v56 = vld [vmem:[#allocation5_spill] sm:$0xff] }
 0x149   : > { %v836_v57 = vpop.permute.xlu1 %835  ;;  %v904_v17 = vmul.f32 %v3029_v18, %v3849_v56  ;;  %v903_v30 = vmul.f32 %v3027_v15, %v3849_v56  ;;  %v2299_v14 = vpop.eup %2298 }
 0x14a   : > { %v913_v8 = vmul.f32 %v3027_v15, %v836_v57  ;;  %v914_v55 = vmul.f32 %v3029_v18, %v836_v57 }
 0x14b   : > { %v952_v41 = vadd.f32 %v904_v17, %v749_v0  ;;  %v1189_v0 = vmul.f32 0.5, %v2299_v14  ;;  %v3857_v14 = vld [vmem:[#allocation19_spill] sm:$0xff] }
 0x14c   : > { %1483 = vperm.xlu1 %2272, %v1377_v49   ;;  %v3335_v3 = vadd.f32 %v913_v8, %v3252_v42  ;;  %v3338_v33 = vadd.f32 %v914_v55, %v3254_v45  ;;  %v708_v42 = vmul.f32 %v3016_v58, %v3070_v5  ;;  %v709_v45 = vmul.f32 %v3018_v61, %v3070_v5 }
 0x14d   : > { %v1128_v5 = vadd.f32 %v3850_v36, %v936_v4  ;;  %v1144_v1 = vadd.f32 %v3854_v59, %v952_v41  ;;  %v951_v8 = vadd.f32 %v903_v30, %v748_v6  ;;  %v2301_v4 = vpop.eup %2300  ;;  %v1205_v17 = vadd.f32 0.5, %v1189_v0  ;;  %v3855_v6 = vld [vmem:[#allocation17_spill] sm:$0xff] }
 0x14e   : > { %v1038_v27 = vpop.permute.xlu1 %1037  ;;  %v756_v57 = vadd.f32 %v708_v42, %v553_v46  ;;  %v757_v49 = vadd.f32 %v709_v45, %v554_v9  ;;  %v1190_v42 = vmul.f32 0.5, %v2301_v4 }
 0x14f   : > { %v3355_v16 = vadd.f32 %v1038_v27, %v945_v11  ;;  %v3357_v44 = vadd.f32 %v1038_v27, %v946_v54  ;;  %2306 = vtanh.f32 %v1128_v5  ;;  %v1143_v7 = vadd.f32 %v3854_v59, %v951_v8  ;;  %v844_v54 = vpop.permute.xlu0 %843 }
 0x150   : > { %1493 = vperm.xlu1 %2272, %v1379_v52   ;;  %2308 = vtanh.f32 %v1127_v37  ;;  %v959_v55 = vadd.f32 %v911_v12, %v756_v57  ;;  %v960_v43 = vadd.f32 %v912_v26, %v757_v49  ;;  %v2303_v52 = vpop.eup %2302  ;;  %v917_v2 = vmul.f32 %v3027_v15, %v844_v54  ;;  %v3856_v12 = vld [vmem:[#allocation18_spill] sm:$0xff] }
 0x151   : > { %2310 = vtanh.f32 %v1141_v38  ;;  %v2305_v45 = vpop.eup %2304  ;;  %v918_v19 = vmul.f32 %v3029_v18, %v844_v54  ;;  %v1199_v9 = vmul.f32 0.5, %v2303_v52  ;;  %v1206_v36 = vadd.f32 0.5, %v1190_v42 }
 0x152   : > { %v3371_v40 = vpop.permute.xlu1 %1042  ;;  %2312 = vtanh.f32 %v1142_v63  ;;  %v1200_v56 = vmul.f32 0.5, %v2305_v45  ;;  %v919_v5 = vmul.f32 %v3027_v15, %v3224_v20  ;;  %v965_v13 = vadd.f32 %v917_v2, %v3855_v6 }
 0x153   : > { %2314 = vtanh.f32 %v1144_v1  ;;  %v966_v26 = vadd.f32 %v918_v19, %v3856_v12  ;;  %v1215_v59 = vadd.f32 0.5, %v1199_v9  ;;  %v565_v12 = vmul.f32 %v3009_v48, %v3281_v35 }
 0x154   : > { %1947 = vperm.xlu1 %2272, %v1944_v47   ;;  %v1216_v1 = vadd.f32 0.5, %v1200_v56  ;;  %v967_v20 = vadd.f32 %v919_v5, %v3857_v14  ;;  %v840_v56 = vpop.permute.xlu0 %839 }
 0x156   : > { %v1073_v23 = vpop.permute.xlu1 %1072 }
 0x157   : > { %v1151_v34 = vadd.f32 %v1073_v23, %v959_v55  ;;  %v1152_v11 = vadd.f32 %v1073_v23, %v960_v43  ;;  %v3858_v23 = vld [vmem:[#allocation20_spill] sm:$0xff] }
 0x158   : > { %v968_v4 = vadd.f32 %v920_v24, %v3858_v23  ;;  %v856_v5 = vpop.permute.xlu0 %855  ;;  %v1139_v24 = vadd.f32 %v3371_v40, %v3180_v29  ;;  %v916_v29 = vmul.f32 %v3029_v18, %v840_v56 }
 0x159   : > { %2316 = vtanh.f32 %v1151_v34  ;;  %v2307_v46 = vpop.eup %2306 }
 0x15a   : > { %2318 = vtanh.f32 %v1152_v11  ;;  %v2309_v37 = vpop.eup %2308  ;;  %v1192_v41 = vmul.f32 0.5, %v2307_v46 }
 0x15b   : > { %2320 = vtanh.f32 %v1143_v7  ;;  %v3380_v27 = vpop.permute.xlu1 %851  ;;  %v2311_v47 = vpop.eup %2310  ;;  %v1191_v49 = vmul.f32 0.5, %v2309_v37  ;;  %v721_v37 = vmul.f32 %v3018_v61, %v3300_v25 }
 0x15c   : > { %v2313_v38 = vpop.eup %2312  ;;  %v1285_v8 = vmul.f32 %v2311_v47, %v1205_v17  ;;  %v1208_v52 = vadd.f32 0.5, %v1192_v41  ;;  %v720_v17 = vmul.f32 %v3016_v58, %v3300_v25  ;;  %v915_v25 = vmul.f32 %v3027_v15, %v840_v56 }
 0x15d   : > { %v2315_v57 = vpop.eup %2314  ;;  %v1286_v43 = vmul.f32 %v2313_v38, %v1206_v36  ;;  %v1207_v2 = vadd.f32 0.5, %v1191_v49 }
 0x15e   : > { %v1288_v19 = vmul.f32 %v2315_v57, %v1208_v52  ;;  %v768_v41 = vadd.f32 %v720_v17, %v565_v12 }
 0x160   : > { %v1088_v60 = vpop.permute.xlu1 %1087 }
 0x161   : > { %v1157_v30 = vadd.f32 %v1088_v60, %v965_v13  ;;  %v1158_v63 = vadd.f32 %v1088_v60, %v966_v26  ;;  %v1140_v26 = vadd.f32 %v3371_v40, %v3182_v32 }
 0x163   : > { %v2317_v55 = vpop.eup %2316  ;;  %2322 = vtanh.f32 %v1157_v30  ;;  %v923_v30 = vmul.f32 %v3027_v15, %v856_v5 }
 0x164   : > { %v2319_v7 = vpop.eup %2318  ;;  %v3390_v34 = vmul.f32 %v2317_v55, %v1215_v59  ;;  %2324 = vtanh.f32 %v1158_v63  ;;  %v1093_v11 = vpop.permute.xlu1 %1092 }
 0x165   : > { %v2321_v54 = vpop.eup %2320  ;;  %v3392_v0 = vmul.f32 %v2319_v7, %v1216_v1  ;;  %v1159_v42 = vadd.f32 %v1093_v11, %v967_v20  ;;  %v1160_v45 = vadd.f32 %v1093_v11, %v968_v4  ;;  %2326 = vtanh.f32 %v1285_v8 }
 0x166   : > { %2328 = vtanh.f32 %v1286_v43  ;;  %v1287_v9 = vmul.f32 %v2321_v54, %v1207_v2  ;;  %v971_v20 = vadd.f32 %v923_v30, %v768_v41  ;;  %v963_v4 = vadd.f32 %v915_v25, %v3266_v62 }
 0x167   : > { %2330 = vtanh.f32 %v1159_v42  ;;  %v964_v54 = vadd.f32 %v916_v29, %v3268_v39  ;;  %v3861_v39 = vld [vmem:[#allocation9_spill] sm:$0xff]  ;;  %v921_v29 = vmul.f32 %v3027_v15, %v3380_v27  ;;  %v922_v41 = vmul.f32 %v3029_v18, %v3380_v27 }
 0x168   : > { %v3394_v46 = vpop.permute.xlu1 %503  ;;  %2332 = vtanh.f32 %v1160_v45 }
 0x169   : > { %2334 = vtanh.f32 %v1288_v19 }
 0x16a   : > { %2336 = vtanh.f32 %v1287_v9  ;;  %v3859_v9 = vld [vmem:[#allocation6_spill] sm:$0xff] }
 0x16b   : > { %2338 = vtanh.f32 %v3355_v16  ;;  %v566_v16 = vmul.f32 %v3011_v51, %v3281_v35  ;;  %v564_v62 = vmul.f32 %v3011_v51, %v3859_v9 }
 0x16c   : > { %2340 = vtanh.f32 %v3357_v44  ;;  %v924_v44 = vmul.f32 %v3029_v18, %v856_v5 }
 0x16d   : > { %v2323_v36 = vpop.eup %2322  ;;  %v3403_v6 = vpop.permute.xlu1 %656  ;;  %v769_v49 = vadd.f32 %v721_v37, %v566_v16  ;;  %2342 = vtanh.f32 %v1139_v24  ;;  %v3860_v37 = vld [vmem:[#allocation14_spill] sm:$0xff]  ;;  %v1163_v24 = vadd.f32 %v3861_v39, %v971_v20 }
 0x16e   : > { %v2325_v13 = vpop.eup %2324  ;;  %v1253_v47 = vmul.f32 0.5, %v2323_v36  ;;  %2344 = vtanh.f32 %v1140_v26  ;;  %v718_v5 = vmul.f32 %v3016_v58, %v3860_v37  ;;  %v719_v12 = vmul.f32 %v3018_v61, %v3860_v37 }
 0x16f   : > { %v1254_v60 = vmul.f32 0.5, %v2325_v13  ;;  %v2327_v38 = vpop.eup %2326  ;;  %v972_v11 = vadd.f32 %v924_v44, %v769_v49 }
 0x170   : > { %v1269_v63 = vadd.f32 0.5, %v1253_v47  ;;  %v2329_v57 = vpop.eup %2328  ;;  %v767_v49 = vadd.f32 %v719_v12, %v564_v62  ;;  %v722_v62 = vmul.f32 %v3016_v58, %v3403_v6 }
 0x171   : > { %v1270_v32 = vadd.f32 0.5, %v1254_v60  ;;  %v2331_v40 = vpop.eup %2330  ;;  %v1164_v26 = vadd.f32 %v3861_v39, %v972_v11 }
 0x172   : > { %v1078_v59 = vpop.permute.xlu1 %1077  ;;  %v1317_v1 = vmul.f32 %v2327_v38, %v1269_v63  ;;  %v2333_v8 = vpop.eup %2332  ;;  %v1255_v35 = vmul.f32 0.5, %v2331_v40 }
 0x173   : > { %v1153_v55 = vadd.f32 %v1078_v59, %v3335_v3  ;;  %v1154_v43 = vadd.f32 %v1078_v59, %v3338_v33  ;;  %v1318_v14 = vmul.f32 %v2329_v57, %v1270_v32  ;;  %v1256_v23 = vmul.f32 0.5, %v2333_v8  ;;  %v2335_v7 = vpop.eup %2334 }
 0x174   : > { %v1271_v52 = vadd.f32 0.5, %v1255_v35  ;;  %v2337_v42 = vpop.eup %2336  ;;  %v563_v3 = vmul.f32 %v3009_v48, %v3859_v9  ;;  %v970_v35 = vadd.f32 %v922_v41, %v767_v49  ;;  %v569_v41 = vmul.f32 %v3009_v48, %v3394_v46 }
 0x175   : > { %2346 = vtanh.f32 %v1153_v55  ;;  %v1272_v2 = vadd.f32 0.5, %v1256_v23  ;;  %v2339_v19 = vpop.eup %2338 }
 0x176   : > { %2348 = vtanh.f32 %v1154_v43  ;;  %v1083_v45 = vpop.permute.xlu1 %1082  ;;  %v1319_v17 = vmul.f32 %v2337_v42, %v1271_v52  ;;  %v2341_v36 = vpop.eup %2340  ;;  %v1201_v25 = vmul.f32 0.5, %v2339_v19  ;;  %v766_v57 = vadd.f32 %v718_v5, %v563_v3 }
 0x177   : > { %v1155_v33 = vadd.f32 %v1083_v45, %v963_v4  ;;  %v1156_v56 = vadd.f32 %v1083_v45, %v964_v54  ;;  %v1320_v13 = vmul.f32 %v2335_v7, %v1272_v2  ;;  %v2343_v60 = vpop.eup %2342  ;;  %v1202_v38 = vmul.f32 0.5, %v2341_v36 }
 0x178   : > { %v2159_v47 = vpack.c.bf16 %v1319_v17, %v1317_v1  ;;  %v2345_v63 = vpop.eup %2344  ;;  %v1217_v44 = vadd.f32 0.5, %v1201_v25  ;;  %v1203_v32 = vmul.f32 0.5, %v2343_v60  ;;  %v969_v8 = vadd.f32 %v921_v29, %v766_v57  ;;  %v3862_v17 = vld [vmem:[#allocation8_spill] sm:$0xff] }
 0x179   : > { %2350 = vtanh.f32 %v1155_v33  ;;  %v2157_v16 = vpack.c.bf16 %v1320_v13, %v1318_v14  ;;  %v1218_v59 = vadd.f32 0.5, %v1202_v38  ;;  %v1204_v1 = vmul.f32 0.5, %v2345_v63  ;;  %v860_v33 = vpop.permute.xlu0 %859  ;;  %v3864_v13 = vld [vmem:[#allocation16_spill] sm:$0xff] }
 0x17a   : > { %2352 = vtanh.f32 %v1156_v56  ;;  %v1219_v4 = vadd.f32 0.5, %v1203_v32  ;;  %v567_v36 = vmul.f32 %v3009_v48, %v3862_v17  ;;  %v726_v12 = vmul.f32 %v3016_v58, %v3864_v13 }
 0x17b   : > { %v3434_v30 = vpop.permute.xlu1 %863  ;;  %2354 = vtanh.f32 %v1163_v24  ;;  %2158 = vmatprep.subr.bf16.mxu0 %v2157_v16  ;;  %2189 = vmatprep.subr.bf16.mxu1 %v2157_v16  ;;  %v1220_v11 = vadd.f32 0.5, %v1204_v1  ;;  %v926_v16 = vmul.f32 %v3029_v18, %v860_v33 }
 0x17c   : > { %2356 = vtanh.f32 %v1164_v26  ;;  %2160 = vmatpush1.bf16.msra.mxu0 %v2159_v47  ;;  %2193 = vmatpush1.bf16.msra.mxu1 %v2159_v47  ;;  %v925_v26 = vmul.f32 %v3027_v15, %v860_v33  ;;  %v770_v57 = vadd.f32 %v722_v62, %v567_v36  ;;  %v928_v36 = vmul.f32 %v3029_v18, %v3434_v30 }
 0x17d   : > { %v872_v63 = vpop.permute.xlu0 %871 }
 0x17f   : > { %v2347_v40 = vpop.eup %2346 }
 0x180   : > { %v2349_v55 = vpop.eup %2348  ;;  %v3436_v27 = vmul.f32 %v2347_v40, %v1217_v44  ;;  %v1098_v43 = vpop.permute.xlu1 %1097  ;;  %v727_v40 = vmul.f32 %v3018_v61, %v3864_v13 }
 0x181   : > { %v3438_v14 = vmul.f32 %v2349_v55, %v1218_v59  ;;  %v1161_v20 = vadd.f32 %v1098_v43, %v969_v8  ;;  %v1162_v23 = vadd.f32 %v1098_v43, %v970_v35  ;;  %v570_v8 = vmul.f32 %v3011_v51, %v3394_v46 }
 0x183   : > { %v2351_v7 = vpop.eup %2350  ;;  %2358 = vtanh.f32 %v1161_v20 }
 0x184   : > { %v2353_v54 = vpop.eup %2352  ;;  %v3440_v52 = vmul.f32 %v2351_v7, %v1219_v4  ;;  %v509_v42 = vpop.permute.xlu1 %508  ;;  %2360 = vtanh.f32 %v1162_v23 }
 0x185   : > { %v3442_v45 = vmul.f32 %v2353_v54, %v1220_v11  ;;  %v2355_v2 = vpop.eup %2354  ;;  %2362 = vtanh.f32 %v3240_v21  ;;  %v723_v21 = vmul.f32 %v3018_v61, %v3403_v6  ;;  %v571_v47 = vmul.f32 %v3009_v48, %v509_v42 }
 0x186   : > { %v2357_v19 = vpop.eup %2356  ;;  %2364 = vtanh.f32 %v3245_v50  ;;  %v1259_v3 = vmul.f32 0.5, %v2355_v2  ;;  %v568_v50 = vmul.f32 %v3011_v51, %v3862_v17  ;;  %v572_v38 = vmul.f32 %v3011_v51, %v509_v42  ;;  %v1118_v17 = vpop.permute.xlu0 %1117 }
 0x187   : > { %2366 = vtanh.f32 %v3229_v53  ;;  %v1260_v56 = vmul.f32 0.5, %v2357_v19  ;;  %v3863_v53 = vld [vmem:[#allocation15_spill] sm:$0xff]  ;;  %v774_v55 = vadd.f32 %v726_v12, %v571_v47 }
 0x188   : > { %v3447_v9 = vpop.permute.xlu1 %513  ;;  %2368 = vtanh.f32 %v3236_v31  ;;  %v724_v37 = vmul.f32 %v3016_v58, %v3863_v53  ;;  %v725_v31 = vmul.f32 %v3018_v61, %v3863_v53  ;;  %v1275_v39 = vadd.f32 0.5, %v1259_v3 }
 0x189   : > { %v1276_v6 = vadd.f32 0.5, %v1260_v56  ;;  %2370 = vtanh.f32 %v3234_v10  ;;  %v771_v49 = vadd.f32 %v723_v21, %v568_v50  ;;  %v775_v4 = vadd.f32 %v727_v40, %v572_v38 }
 0x18a   : > { %2372 = vtanh.f32 %v3238_v22  ;;  %v772_v42 = vadd.f32 %v724_v37, %v569_v41  ;;  %v973_v22 = vadd.f32 %v925_v26, %v770_v57  ;;  %v927_v3 = vmul.f32 %v3027_v15, %v3434_v30 }
 0x18b   : > { %v974_v19 = vadd.f32 %v926_v16, %v771_v49  ;;  %v773_v53 = vadd.f32 %v725_v31, %v570_v8  ;;  %v573_v37 = vmul.f32 %v3009_v48, %v3447_v9  ;;  %2374 = vtanh.f32 %v3436_v27 }
 0x18c   : > { %v574_v12 = vmul.f32 %v3011_v51, %v3447_v9  ;;  %v932_v51 = vmul.f32 %v3029_v18, %v872_v63 }
 0x18d   : > { %v669_v5 = vpop.permute.xlu1 %668  ;;  %v2359_v24 = vpop.eup %2358  ;;  %v976_v48 = vadd.f32 %v928_v36, %v773_v53 }
 0x18e   : > { %v2361_v25 = vpop.eup %2360  ;;  %v1257_v60 = vmul.f32 0.5, %v2359_v24  ;;  %v728_v62 = vmul.f32 %v3016_v58, %v669_v5  ;;  %v729_v21 = vmul.f32 %v3018_v61, %v669_v5  ;;  %v975_v61 = vadd.f32 %v927_v3, %v772_v42 }
 0x18f   : > { %v2363_v29 = vpop.eup %2362  ;;  %v1258_v44 = vmul.f32 0.5, %v2361_v25 }
 0x190   : > { %v2365_v32 = vpop.eup %2364  ;;  %v1273_v10 = vadd.f32 0.5, %v1257_v60  ;;  %v1323_v59 = vmul.f32 %v2363_v29, %v1275_v39  ;;  %v776_v31 = vadd.f32 %v728_v62, %v573_v37  ;;  %v777_v5 = vadd.f32 %v729_v21, %v574_v12  ;;  %v1334_v12 = vld [vmem:[%s3809_s5 + $0x8] sm:$0xff] }
 0x191   : > { %v2367_v1 = vpop.eup %2366  ;;  %v1274_v35 = vadd.f32 0.5, %v1258_v44  ;;  %v1324_v20 = vmul.f32 %v2365_v32, %v1276_v6  ;;  %v931_v6 = vmul.f32 %v3027_v15, %v872_v63 }
 0x192   : > { %v868_v43 = vpop.permute.xlu1 %867  ;;  %v2369_v23 = vpop.eup %2368  ;;  %v1321_v54 = vmul.f32 %v2367_v1, %v1273_v10  ;;  %v980_v60 = vadd.f32 %v932_v51, %v777_v5  ;;  %v1337_v5 = vld [vmem:[%s3809_s5 + $0x20] sm:$0xff]  ;;  %v1352_v51 = vld [vmem:[%s3809_s5 + $0x98] sm:$0xff] }
 0x193   : > { %v929_v7 = vmul.f32 %v3027_v15, %v868_v43  ;;  %v930_v11 = vmul.f32 %v3029_v18, %v868_v43  ;;  %v1322_v2 = vmul.f32 %v2369_v23, %v1274_v35  ;;  %v2371_v58 = vpop.eup %2370  ;;  %v979_v16 = vadd.f32 %v931_v6, %v776_v31  ;;  %v1349_v31 = vld [vmem:[%s3809_s5 + $0x80] sm:$0xff]  ;;  %v1351_v6 = vld [vmem:[%s3809_s5 + $0x90] sm:$0xff] }
 0x194   : > { %v2163_v56 = vpack.c.bf16 %v1323_v59, %v1321_v54  ;;  %v2373_v47 = vpop.eup %2372 }
 0x195   : > { %v977_v33 = vadd.f32 %v929_v7, %v774_v55  ;;  %v978_v46 = vadd.f32 %v930_v11, %v775_v4  ;;  %v2161_v50 = vpack.c.bf16 %v1324_v20, %v1322_v2  ;;  %v2375_v15 = vpop.eup %2374 }
 0x197   : > { %v1169_v39 = vadd.f32 %v1118_v17, %v977_v33  ;;  %v1170_v24 = vadd.f32 %v1118_v17, %v978_v46  ;;  %v1108_v13 = vpop.permute.xlu1 %1107  ;;  %2162 = vmatprep.subr.bf16.mxu0 %v2161_v50  ;;  %2190 = vmatprep.subr.bf16.mxu1 %v2161_v50 }
 0x198   : > { %v1165_v30 = vadd.f32 %v1108_v13, %v973_v22  ;;  %v1166_v26 = vadd.f32 %v1108_v13, %v974_v19  ;;  %2164 = vmatpush1.bf16.msra.mxu0 %v2163_v56  ;;  %2194 = vmatpush1.bf16.msra.mxu1 %v2163_v56  ;;  %v1346_v13 = vld [vmem:[%s3809_s5 + $0x68] sm:$0xff] }
 0x199   : > { %2376 = vtanh.f32 %v1169_v39 }
 0x19a   : > { %2378 = vtanh.f32 %v1170_v24  ;;  %v1333_v24 = vld [vmem:[%s3809_s5] sm:$0xff] }
 0x19b   : > { %2380 = vtanh.f32 %v1165_v30  ;;  %v1113_v27 = vpop.permute.xlu1 %1112  ;;  %v1347_v30 = vld [vmem:[%s3809_s5 + $0x70] sm:$0xff] }
 0x19c   : > { %2382 = vtanh.f32 %v1166_v26  ;;  %v1167_v9 = vadd.f32 %v1113_v27, %v975_v61  ;;  %v1168_v25 = vadd.f32 %v1113_v27, %v976_v48  ;;  %v1335_v26 = vld [vmem:[%s3809_s5 + $0x10] sm:$0xff]  ;;  %v1336_v61 = vld [vmem:[%s3809_s5 + $0x18] sm:$0xff]  ;;  %v1350_v48 = vld [vmem:[%s3809_s5 + $0x88] sm:$0xff] }
 0x19d   : > { %2384 = vtanh.f32 %v3438_v14  ;;  %v1339_v27 = vld [vmem:[%s3809_s5 + $0x30] sm:$0xff] }
 0x19e   : > { %2386 = vtanh.f32 %v1167_v9  ;;  %v1340_v9 = vld [vmem:[%s3809_s5 + $0x38] sm:$0xff] }
 0x19f   : > { %2388 = vtanh.f32 %v1168_v25  ;;  %v1123_v38 = vpop.permute.xlu1 %1122  ;;  %v1353_v25 = vld [vmem:[%s3809_s5 + $0xa0] sm:$0xff] }
 0x1a0   : > { %2390 = vtanh.f32 %v3390_v34  ;;  %v1171_v29 = vadd.f32 %v1123_v38, %v979_v16  ;;  %v1172_v41 = vadd.f32 %v1123_v38, %v980_v60  ;;  %v1341_v16 = vld [vmem:[%s3809_s5 + $0x40] sm:$0xff]  ;;  %v1354_v60 = vld [vmem:[%s3809_s5 + $0xa8] sm:$0xff] }
 0x1a1   : > { %2392 = vtanh.f32 %v3392_v0  ;;  %v1342_v38 = vld [vmem:[%s3809_s5 + $0x48] sm:$0xff] }
 0x1a2   : > { %2394 = vtanh.f32 %v1171_v29  ;;  %v1355_v29 = vld [vmem:[%s3809_s5 + $0xb0] sm:$0xff] }
 0x1a3   : > { %v2377_v57 = vpop.eup %2376  ;;  %2396 = vtanh.f32 %v1172_v41  ;;  %v1343_v41 = vld [vmem:[%s3809_s5 + $0x50] sm:$0xff] }
 0x1a4   : > { %v2379_v18 = vpop.eup %2378  ;;  %v1265_v63 = vmul.f32 0.5, %v2377_v57  ;;  %2398 = vtanh.f32 %v3440_v52  ;;  %v1344_v57 = vld [vmem:[%s3809_s5 + $0x58] sm:$0xff] }
 0x1a5   : > { %v2381_v49 = vpop.eup %2380  ;;  %v1266_v44 = vmul.f32 0.5, %v2379_v18  ;;  %2400 = vtanh.f32 %v3442_v45  ;;  %v1345_v18 = vld [vmem:[%s3809_s5 + $0x60] sm:$0xff] }
 0x1a6   : > { %v2383_v14 = vpop.eup %2382  ;;  %v1261_v32 = vmul.f32 0.5, %v2381_v49  ;;  %v1281_v40 = vadd.f32 0.5, %v1265_v63  ;;  %v1384_v63 = vpop.permute.xlu1 %1383 }
 0x1a7   : > { %v2385_v10 = vpop.eup %2384  ;;  %v1262_v34 = vmul.f32 0.5, %v2383_v14  ;;  %v1282_v59 = vadd.f32 0.5, %v1266_v44  ;;  %v1389_v49 = vpop.permute.xlu0 %1388 }
 0x1a8   : > { %v2387_v1 = vpop.eup %2386  ;;  %v1277_v0 = vadd.f32 0.5, %v1261_v32  ;;  %v1329_v8 = vmul.f32 %v2375_v15, %v1281_v40  ;;  %v1356_v15 = vld [vmem:[%s3809_s5 + $0xb8] sm:$0xff] }
 0x1a9   : > { %v2389_v35 = vpop.eup %2388  ;;  %v1278_v55 = vadd.f32 0.5, %v1262_v34  ;;  %v1263_v43 = vmul.f32 0.5, %v2387_v1  ;;  %v1330_v20 = vmul.f32 %v2385_v10, %v1282_v59 }
 0x1aa   : > { %v2391_v23 = vpop.eup %2390  ;;  %v1264_v4 = vmul.f32 0.5, %v2389_v35  ;;  %v1325_v7 = vmul.f32 %v2371_v58, %v1277_v0  ;;  %v1348_v58 = vld [vmem:[%s3809_s5 + $0x78] sm:$0xff]  ;;  %v1394_v44 = vpop.permute.xlu1 %1393 }
 0x1ab   : > { %v2393_v11 = vpop.eup %2392  ;;  %v1279_v54 = vadd.f32 0.5, %v1263_v43  ;;  %v1326_v52 = vmul.f32 %v2373_v47, %v1278_v55  ;;  %v1338_v47 = vld [vmem:[%s3809_s5 + $0x28] sm:$0xff]  ;;  %v1399_v14 = vpop.permute.xlu0 %1398 }
 0x1ac   : > { %v2395_v42 = vpop.eup %2394  ;;  %v1280_v2 = vadd.f32 0.5, %v1264_v4 }
 0x1ad   : > { %v2397_v22 = vpop.eup %2396  ;;  %v1267_v19 = vmul.f32 0.5, %v2395_v42  ;;  %v1327_v45 = vmul.f32 %v2391_v23, %v1279_v54 }
 0x1ae   : > { %v1268_v3 = vmul.f32 0.5, %v2397_v22  ;;  %v1328_v33 = vmul.f32 %v2393_v11, %v1280_v2  ;;  %v2399_v17 = vpop.eup %2398  ;;  %v3615_v32 = vpop.permute.xlu1 %1423 }
 0x1af   : > { %v1283_v46 = vadd.f32 0.5, %v1267_v19  ;;  %v2167_v56 = vpack.c.bf16 %v1327_v45, %v1325_v7  ;;  %v2401_v21 = vpop.eup %2400  ;;  %v3617_v40 = vpop.permute.xlu0 %1428 }
 0x1b0   : > { %v1284_v36 = vadd.f32 0.5, %v1268_v3  ;;  %v2165_v62 = vpack.c.bf16 %v1328_v33, %v1326_v52 }
 0x1b1   : > { %v1331_v50 = vmul.f32 %v2399_v17, %v1283_v46 }
 0x1b2   : > { %2166 = vmatprep.subr.bf16.mxu0 %v2165_v62  ;;  %2191 = vmatprep.subr.bf16.mxu1 %v2165_v62  ;;  %v1332_v53 = vmul.f32 %v2401_v21, %v1284_v36  ;;  %v3619_v10 = vpop.permute.xlu1 %1403 }
 0x1b3   : > { %2168 = vmatpush1.bf16.msra.mxu0 %v2167_v56  ;;  %2195 = vmatpush1.bf16.msra.mxu1 %v2167_v56  ;;  %v2171_v37 = vpack.c.bf16 %v1331_v50, %v1329_v8  ;;  %v3621_v34 = vpop.permute.xlu0 %1408 }
 0x1b4   : > { %v2169_v39 = vpack.c.bf16 %v1332_v53, %v1330_v20 }
 0x1b6   : > { %2170 = vmatprep.subr.bf16.mxu0 %v2169_v39  ;;  %2192 = vmatprep.subr.bf16.mxu1 %v2169_v39  ;;  %v3623_v59 = vpop.permute.xlu1 %1433 }
 0x1b7   : > { %2172 = vmatpush1.bf16.msra.mxu0 %v2171_v37  ;;  %2196 = vmatpush1.bf16.msra.mxu1 %v2171_v37 }
 0x1ba   : > { %2126 = vmatmul.mubr.msk.f32.vlgmr.msra.gmra.mrb[0].mxu0 %vm1501_vm0, %v1333_v24  ;;  %2139 = vmatmul.mubr.msk.f32.vlgmr.msra.gmra.mrb[0].mxu1 %vm1501_vm0, %v1346_v13  ;;  %v3627_v1 = vpop.permute.xlu1 %1413 }
 0x1bb   : > { %1644 = vmatprep.mubr.f32.mxu0 %v2597_v28  ;;  %1722 = vmatprep.mubr.f32.mxu1 %v2597_v28 }
 0x1be   : > { %2127 = vmatmul.mubr.msk.f32.gmra.mrb[2].mxu0 %vm1501_vm0, %v1334_v12  ;;  %2140 = vmatmul.mubr.msk.f32.gmra.mrb[2].mxu1 %vm1501_vm0, %v1347_v30  ;;  %v3631_v8 = vpop.permute.xlu1 %1443 }
 0x1bf   : > { %1650 = vmatprep.mubr.f32.mxu0 %v2597_v28  ;;  %1728 = vmatprep.mubr.f32.mxu1 %v2597_v28 }
 0x1c2   : > { %2128 = vmatmul.mubr.msk.f32.gmra.mrb[4].mxu0 %vm1501_vm0, %v1335_v26  ;;  %2141 = vmatmul.mubr.msk.f32.gmra.mrb[4].mxu1 %vm1501_vm0, %v1348_v58  ;;  %v1464_v55 = vpop.permute.xlu1 %1463 }
 0x1c3   : > { %1656 = vmatprep.mubr.f32.mxu0 %v2597_v28  ;;  %1734 = vmatprep.mubr.f32.mxu1 %v2597_v28 }
 0x1c6   : > { %2129 = vmatmul.mubr.msk.f32.gmra.mrb[6].mxu0 %vm1501_vm0, %v1336_v61  ;;  %2142 = vmatmul.mubr.msk.f32.gmra.mrb[6].mxu1 %vm1501_vm0, %v1349_v31  ;;  %v1454_v3 = vpop.permute.xlu1 %1453 }
 0x1c7   : > { %1662 = vmatprep.mubr.f32.mxu0 %v2597_v28  ;;  %1740 = vmatprep.mubr.f32.mxu1 %v2597_v28 }
 0x1ca   : > { %2130 = vmatmul.mubr.msk.f32.gmra.mrb[8].mxu0 %vm1501_vm0, %v1337_v5  ;;  %2143 = vmatmul.mubr.msk.f32.gmra.mrb[8].mxu1 %vm1501_vm0, %v1350_v48 }
 0x1cb   : > { %1668 = vmatprep.mubr.f32.mxu0 %v2597_v28  ;;  %1746 = vmatprep.mubr.f32.mxu1 %v2597_v28 }
 0x1ce   : > { %2131 = vmatmul.mubr.msk.f32.gmra.mrb[10].mxu0 %vm1501_vm0, %v1338_v47  ;;  %2144 = vmatmul.mubr.msk.f32.gmra.mrb[10].mxu1 %vm1501_vm0, %v1351_v6 }
 0x1cf   : > { %1674 = vmatprep.mubr.f32.mxu0 %v2597_v28  ;;  %1752 = vmatprep.mubr.f32.mxu1 %v2597_v28 }
 0x1d2   : > { %2132 = vmatmul.mubr.msk.f32.gmra.mrb[12].mxu0 %vm1501_vm0, %v1339_v27  ;;  %2145 = vmatmul.mubr.msk.f32.gmra.mrb[12].mxu1 %vm1501_vm0, %v1352_v51 }
 0x1d3   : > { %1680 = vmatprep.mubr.f32.mxu0 %v2597_v28  ;;  %1758 = vmatprep.mubr.f32.mxu1 %v2597_v28 }
 0x1d6   : > { %2133 = vmatmul.mubr.msk.f32.gmra.mrb[14].mxu0 %vm1501_vm0, %v1340_v9  ;;  %2146 = vmatmul.mubr.msk.f32.gmra.mrb[14].mxu1 %vm1501_vm0, %v1353_v25 }
 0x1d7   : > { %1686 = vmatprep.mubr.f32.mxu0 %v2597_v28  ;;  %1764 = vmatprep.mubr.f32.mxu1 %v2597_v28 }
 0x1da   : > { %2134 = vmatmul.mubr.msk.f32.gmra.mrb[16].mxu0 %vm1501_vm0, %v1341_v16  ;;  %2147 = vmatmul.mubr.msk.f32.gmra.mrb[16].mxu1 %vm1501_vm0, %v1354_v60 }
 0x1db   : > { %1692 = vmatprep.mubr.f32.mxu0 %v2597_v28  ;;  %1770 = vmatprep.mubr.f32.mxu1 %v2597_v28 }
 0x1de   : > { %2135 = vmatmul.mubr.msk.f32.gmra.mrb[18].mxu0 %vm1501_vm0, %v1342_v38  ;;  %2148 = vmatmul.mubr.msk.f32.gmra.mrb[18].mxu1 %vm1501_vm0, %v1355_v29 }
 0x1df   : > { %1698 = vmatprep.mubr.f32.mxu0 %v2597_v28  ;;  %1776 = vmatprep.mubr.f32.mxu1 %v2597_v28 }
 0x1e2   : > { %2136 = vmatmul.mubr.msk.f32.gmra.mrb[20].mxu0 %vm1501_vm0, %v1343_v41  ;;  %2149 = vmatmul.mubr.msk.f32.gmra.mrb[20].mxu1 %vm1501_vm0, %v1356_v15 }
 0x1e3   : > { %1704 = vmatprep.mubr.f32.mxu0 %v2597_v28  ;;  %2017 = vmatprep.mubr.f32.mxu1 %v2597_v28 }
 0x1e6   : > { %2137 = vmatmul.mubr.msk.f32.gmra.mrb[22].mxu0 %vm1501_vm0, %v1344_v57 }
 0x1e7   : > { %1710 = vmatprep.mubr.f32.mxu0 %v2597_v28  ;;  %v3625_v28 = vpop.permute.xlu0 %1438 }
 0x1ea   : > { %2138 = vmatmul.mubr.msk.f32.gmra.mrb[24].mxu0 %vm1501_vm0, %v1345_v18 }
 0x1eb   : > { %v3629_v0 = vpop.permute.xlu0 %1418 }
 0x1ef   : > { %v1449_v35 = vpop.permute.xlu0 %1448 }
 0x1f3   : > { %v3633_v7 = vpop.permute.xlu0 %1468 }
 0x1f7   : > { %v1459_v53 = vpop.permute.xlu0 %1458 }
 0x28d   : > { %v1640_v43 = vpop.f32.mrb[0].mxu0  ;;  %v1718_v20 = vpop.f32.mrb[0].mxu1 }
 0x28e   : > { %v1642_v23 = vpop.f32.mrb[1].mxu0  ;;  %v1720_v4 = vpop.f32.mrb[1].mxu1  ;;  %v1641_v11 = vadd.f32 %v1640_v43, %v1384_v63  ;;  %v1719_v54 = vadd.f32 %v1718_v20, %v1449_v35 }
 0x28f   : > { %v1643_v2 = vadd.f32 %v1642_v23, %v1384_v63  ;;  %v1721_v45 = vadd.f32 %v1720_v4, %v1449_v35  ;;  %v1474_v43 = vpop.permute.xlu1 %1473 }
 0x290   : > { %2402 = vtanh.f32 %v1641_v11 }
 0x291   : > { %v1646_v52 = vpop.f32.mrb[2].mxu0  ;;  %v1724_v42 = vpop.f32.mrb[2].mxu1  ;;  %2404 = vtanh.f32 %v1719_v54 }
 0x292   : > { %v1648_v22 = vpop.f32.mrb[3].mxu0  ;;  %v1726_v19 = vpop.f32.mrb[3].mxu1  ;;  %v1647_v33 = vadd.f32 %v1646_v52, %v1389_v49  ;;  %v1725_v46 = vadd.f32 %v1724_v42, %v1454_v3  ;;  %2406 = vtanh.f32 %v1643_v2 }
 0x293   : > { %v1649_v36 = vadd.f32 %v1648_v22, %v1389_v49  ;;  %2408 = vtanh.f32 %v1721_v45  ;;  %v1727_v50 = vadd.f32 %v1726_v19, %v1454_v3 }
 0x294   : > { %2410 = vtanh.f32 %v1647_v33 }
 0x295   : > { %v1652_v56 = vpop.f32.mrb[4].mxu0  ;;  %v1730_v17 = vpop.f32.mrb[4].mxu1  ;;  %2412 = vtanh.f32 %v1725_v46 }
 0x296   : > { %v1654_v62 = vpop.f32.mrb[5].mxu0  ;;  %v1732_v21 = vpop.f32.mrb[5].mxu1  ;;  %v1653_v37 = vadd.f32 %v1652_v56, %v1394_v44  ;;  %v1731_v39 = vadd.f32 %v1730_v17, %v1459_v53  ;;  %2414 = vtanh.f32 %v1649_v36 }
 0x297   : > { %v1655_v12 = vadd.f32 %v1654_v62, %v1394_v44  ;;  %2416 = vtanh.f32 %v1727_v50  ;;  %v1733_v58 = vadd.f32 %v1732_v21, %v1459_v53  ;;  %v3684_v53 = vpop.permute.xlu1 %1483 }
 0x298   : > { %2418 = vtanh.f32 %v1653_v37 }
 0x299   : > { %v1658_v24 = vpop.f32.mrb[6].mxu0  ;;  %v1736_v13 = vpop.f32.mrb[6].mxu1  ;;  %2420 = vtanh.f32 %v1731_v39 }
 0x29a   : > { %v1660_v30 = vpop.f32.mrb[7].mxu0  ;;  %v1738_v26 = vpop.f32.mrb[7].mxu1  ;;  %v1659_v61 = vadd.f32 %v1658_v24, %v1399_v14  ;;  %v1737_v31 = vadd.f32 %v1736_v13, %v1464_v55  ;;  %2422 = vtanh.f32 %v1655_v12 }
 0x29b   : > { %v3635_v47 = vpop.eup %2402  ;;  %v1661_v6 = vadd.f32 %v1660_v30, %v1399_v14  ;;  %2424 = vtanh.f32 %v1733_v58  ;;  %v1739_v25 = vadd.f32 %v1738_v26, %v1464_v55  ;;  %v3653_v55 = vpop.permute.xlu0 %1478 }
 0x29c   : > { %v3637_v9 = vpop.eup %2404  ;;  %2426 = vtanh.f32 %v1659_v61 }
 0x29d   : > { %v1664_v5 = vpop.f32.mrb[8].mxu0  ;;  %v1742_v48 = vpop.f32.mrb[8].mxu1  ;;  %2428 = vtanh.f32 %v1737_v31 }
 0x29e   : > { %v1666_v27 = vpop.f32.mrb[9].mxu0  ;;  %v1744_v51 = vpop.f32.mrb[9].mxu1  ;;  %v1665_v38 = vadd.f32 %v1664_v5, %v3619_v10  ;;  %2430 = vtanh.f32 %v1661_v6  ;;  %v1743_v44 = vadd.f32 %v1742_v48, %v3633_v7 }
 0x29f   : > { %v3639_v16 = vpop.eup %2406  ;;  %2432 = vtanh.f32 %v1739_v25  ;;  %v1667_v23 = vadd.f32 %v1666_v27, %v3619_v10  ;;  %v1745_v22 = vadd.f32 %v1744_v51, %v3633_v7  ;;  %v1489_v50 = vpop.permute.xlu0 %1488 }
 0x2a0   : > { %v3641_v60 = vpop.eup %2408 }
 0x2a1   : > { %v1670_v29 = vpop.f32.mrb[10].mxu0  ;;  %v1748_v41 = vpop.f32.mrb[10].mxu1 }
 0x2a2   : > { %v3644_v15 = vpop.eup %2410  ;;  %v1671_v57 = vadd.f32 %v1670_v29, %v3621_v34  ;;  %v1672_v18 = vpop.f32.mrb[11].mxu0  ;;  %v1749_v3 = vadd.f32 %v1748_v41, %v1474_v43 }
 0x2a3   : > { %v1750_v63 = vpop.f32.mrb[11].mxu1  ;;  %v3647_v49 = vpop.eup %2412  ;;  %v1673_v14 = vadd.f32 %v1672_v18, %v3621_v34 }
 0x2a4   : > { %v3651_v35 = vpop.eup %2414  ;;  %2434 = vtanh.f32 %v1671_v57 }
 0x2a5   : > { %v3655_v20 = vpop.eup %2416  ;;  %2436 = vtanh.f32 %v1665_v38  ;;  %v1676_v4 = vpop.f32.mrb[12].mxu0 }
 0x2a6   : > { %v3658_v11 = vpop.f32.mrb[12].mxu1  ;;  %v3660_v54 = vpop.eup %2418  ;;  %2438 = vtanh.f32 %v1673_v14  ;;  %v1677_v52 = vadd.f32 %v1676_v4, %v3627_v1 }
 0x2a7   : > { %v1678_v34 = vpop.f32.mrb[13].mxu0  ;;  %v3663_v42 = vpop.f32.mrb[13].mxu1  ;;  %2440 = vtanh.f32 %v1743_v44 }
 0x2a8   : > { %v3665_v2 = vpop.eup %2420  ;;  %v1679_v19 = vadd.f32 %v1678_v34, %v3627_v1  ;;  %2442 = vtanh.f32 %v1677_v52  ;;  %v1751_v1 = vadd.f32 %v1750_v63, %v1474_v43  ;;  %v1494_v14 = vpop.permute.xlu1 %1493  ;;  %v1799_v52 = vmul.f32 0.5, %v3635_v47 }
 0x2a9   : > { %v3669_v45 = vpop.eup %2422  ;;  %2444 = vtanh.f32 %v1667_v23  ;;  %v1682_v33 = vpop.f32.mrb[14].mxu0 }
 0x2aa   : > { %v3671_v10 = vpop.eup %2424  ;;  %v3673_v46 = vpop.f32.mrb[14].mxu1  ;;  %2446 = vtanh.f32 %v1679_v19  ;;  %v1683_v17 = vadd.f32 %v1682_v33, %v3629_v0 }
 0x2ab   : > { %v3675_v56 = vpop.eup %2426  ;;  %v1684_v36 = vpop.f32.mrb[15].mxu0  ;;  %2448 = vtanh.f32 %v1745_v22 }
 0x2ac   : > { %v3678_v62 = vpop.f32.mrb[15].mxu1  ;;  %v3680_v7 = vpop.eup %2428  ;;  %2450 = vtanh.f32 %v1683_v17  ;;  %v1685_v37 = vadd.f32 %v1684_v36, %v3629_v0 }
 0x2ad   : > { %v3682_v21 = vpop.eup %2430  ;;  %2452 = vtanh.f32 %v1749_v3  ;;  %v1688_v24 = vpop.f32.mrb[16].mxu0 }
 0x2ae   : > { %v3687_v39 = vpop.eup %2432  ;;  %v1766_v13 = vpop.f32.mrb[16].mxu1  ;;  %2454 = vtanh.f32 %v1685_v37  ;;  %v1689_v30 = vadd.f32 %v1688_v24, %v3615_v32 }
 0x2af   : > { %v2435_v12 = vpop.eup %2434  ;;  %v1690_v26 = vpop.f32.mrb[17].mxu0  ;;  %2456 = vtanh.f32 %v1751_v1  ;;  %v1767_v5 = vadd.f32 %v1766_v13, %v1489_v50 }
 0x2b0   : > { %v1768_v58 = vpop.f32.mrb[17].mxu1  ;;  %v3690_v61 = vpop.eup %2436  ;;  %v1809_v31 = vmul.f32 0.5, %v2435_v12  ;;  %2458 = vtanh.f32 %v1689_v30  ;;  %v1691_v0 = vadd.f32 %v1690_v26, %v3615_v32  ;;  %v1815_v26 = vadd.f32 0.5, %v1799_v52 }
 0x2b1   : > { %v2439_v48 = vpop.eup %2438  ;;  %2460 = vtanh.f32 %v1767_v5  ;;  %v1769_v25 = vadd.f32 %v1768_v58, %v1489_v50  ;;  %v1694_v38 = vpop.f32.mrb[18].mxu0  ;;  %v1801_v58 = vmul.f32 0.5, %v3644_v15 }
 0x2b2   : > { %v3693_v6 = vpop.eup %2440  ;;  %v1825_v27 = vadd.f32 0.5, %v1809_v31  ;;  %v1810_v51 = vmul.f32 0.5, %v2439_v48  ;;  %v1772_v29 = vpop.f32.mrb[18].mxu1  ;;  %2462 = vtanh.f32 %v1691_v0  ;;  %v1695_v57 = vadd.f32 %v1694_v38, %v3617_v40 }
 0x2b3   : > { %v2443_v41 = vpop.eup %2442  ;;  %v1696_v18 = vpop.f32.mrb[19].mxu0  ;;  %2464 = vtanh.f32 %v1769_v25  ;;  %v1773_v34 = vadd.f32 %v1772_v29, %v1494_v14 }
 0x2b4   : > { %v1774_v63 = vpop.f32.mrb[19].mxu1  ;;  %v3696_v44 = vpop.eup %2444  ;;  %v1905_v43 = vmul.f32 %v3637_v9, %v1825_v27  ;;  %v1826_v32 = vadd.f32 0.5, %v1810_v51  ;;  %v1811_v23 = vmul.f32 0.5, %v2443_v41  ;;  %2466 = vtanh.f32 %v1695_v57 }
 0x2b5   : > { %v2447_v4 = vpop.eup %2446  ;;  %v1700_v17 = vpop.f32.mrb[20].mxu0  ;;  %v1800_v9 = vmul.f32 0.5, %v3639_v16  ;;  %v1697_v50 = vadd.f32 %v1696_v18, %v3617_v40  ;;  %v1775_v31 = vadd.f32 %v1774_v63, %v1494_v14  ;;  %v1817_v18 = vadd.f32 0.5, %v1801_v58 }
 0x2b6   : > { %v3700_v22 = vpop.eup %2448  ;;  %2468 = vtanh.f32 %v1905_v43  ;;  %v1906_v19 = vmul.f32 %v3641_v60, %v1826_v32  ;;  %v1827_v3 = vadd.f32 0.5, %v1811_v23  ;;  %v1812_v33 = vmul.f32 0.5, %v2447_v4  ;;  %v1778_v36 = vpop.f32.mrb[20].mxu1 }
 0x2b7   : > { %v2451_v1 = vpop.eup %2450  ;;  %2470 = vtanh.f32 %v1773_v34  ;;  %v1702_v37 = vpop.f32.mrb[21].mxu0  ;;  %v1816_v51 = vadd.f32 0.5, %v1800_v9  ;;  %v1802_v43 = vmul.f32 0.5, %v3651_v35 }
 0x2b8   : > { %v1780_v24 = vpop.f32.mrb[21].mxu1  ;;  %v3705_v47 = vpop.eup %2452  ;;  %2472 = vtanh.f32 %v1906_v19  ;;  %v1907_v13 = vmul.f32 %v3647_v49, %v1827_v3  ;;  %v1828_v12 = vadd.f32 0.5, %v1812_v33  ;;  %v1813_v30 = vmul.f32 0.5, %v2451_v1 }
 0x2b9   : > { %v2455_v60 = vpop.eup %2454  ;;  %2474 = vtanh.f32 %v1697_v50  ;;  %v1706_v0 = vpop.f32.mrb[22].mxu0  ;;  %v1701_v49 = vadd.f32 %v1700_v17, %v3623_v59  ;;  %v1803_v17 = vmul.f32 0.5, %v3660_v54  ;;  %v1703_v9 = vadd.f32 %v1702_v37, %v3623_v59 }
 0x2ba   : > { %v3709_v5 = vpop.eup %2456  ;;  %2476 = vtanh.f32 %v1907_v13  ;;  %v1908_v40 = vmul.f32 %v3655_v20, %v1828_v12  ;;  %v1829_v16 = vadd.f32 0.5, %v1813_v30  ;;  %v1814_v48 = vmul.f32 0.5, %v2455_v60  ;;  %v1708_v25 = vpop.f32.mrb[23].mxu0 }
 0x2bb   : > { %v2459_v27 = vpop.eup %2458  ;;  %2478 = vtanh.f32 %v1775_v31  ;;  %v1499_v14 = vpop.permute.xlu0 %1498  ;;  %v1818_v30 = vadd.f32 0.5, %v1802_v43  ;;  %v1707_v54 = vadd.f32 %v1706_v0, %v3625_v28 }
 0x2bc   : > { %v2461_v38 = vpop.eup %2460  ;;  %2480 = vtanh.f32 %v1908_v40  ;;  %v1909_v15 = vmul.f32 %v3665_v2, %v1829_v16  ;;  %v1830_v29 = vadd.f32 0.5, %v1814_v48  ;;  %v1895_v41 = vmul.f32 %v2459_v27, %v1815_v26 }
 0x2bd   : > { %v2463_v57 = vpop.eup %2462  ;;  %v1873_v63 = vmul.f32 0.5, %v2461_v38  ;;  %2482 = vtanh.f32 %v1701_v49  ;;  %v1712_v4 = vpop.f32.mrb[24].mxu0  ;;  %v1779_v2 = vadd.f32 %v1778_v36, %v1499_v14  ;;  %v1781_v13 = vadd.f32 %v1780_v24, %v1499_v14 }
 0x2be   : > { %v2465_v20 = vpop.eup %2464  ;;  %2484 = vtanh.f32 %v1909_v15  ;;  %v1910_v32 = vmul.f32 %v3671_v10, %v1830_v29  ;;  %v1896_v23 = vmul.f32 %v2463_v57, %v1816_v51  ;;  %v1714_v3 = vpop.f32.mrb[25].mxu0  ;;  %v1863_v36 = vmul.f32 0.5, %v3680_v7 }
 0x2bf   : > { %v2467_v52 = vpop.eup %2466  ;;  %2486 = vtanh.f32 %v1895_v41  ;;  %v1889_v34 = vadd.f32 0.5, %v1873_v63  ;;  %v1874_v19 = vmul.f32 0.5, %v2465_v20  ;;  %v1709_v40 = vadd.f32 %v1708_v25, %v3625_v28 }
 0x2c0   : > { %v2469_v33 = vpop.eup %2468  ;;  %2488 = vtanh.f32 %v1910_v32  ;;  %v1897_v1 = vmul.f32 %v2467_v52, %v1817_v18  ;;  %v1819_v24 = vadd.f32 0.5, %v1803_v17  ;;  %v1713_v48 = vadd.f32 %v1712_v4, %v3631_v8 }
 0x2c1   : > { %v2471_v50 = vpop.eup %2470  ;;  %v3718_v35 = vmul.f32 %v2469_v33, %v1889_v34  ;;  %2490 = vtanh.f32 %v1896_v23  ;;  %v1890_v10 = vadd.f32 0.5, %v1874_v19  ;;  %v1864_v51 = vmul.f32 0.5, %v3687_v39 }
 0x2c2   : > { %v2473_v12 = vpop.eup %2472  ;;  %2492 = vtanh.f32 %v1897_v1  ;;  %v1875_v60 = vmul.f32 0.5, %v2471_v50  ;;  %v1865_v38 = vmul.f32 0.5, %v3693_v6  ;;  %v1755_v15 = vadd.f32 %v3658_v11, %v3653_v55 }
 0x2c3   : > { %v2475_v26 = vpop.eup %2474  ;;  %2494 = vtanh.f32 %v1779_v2  ;;  %v3722_v58 = vmul.f32 %v2473_v12, %v1890_v10  ;;  %v1715_v28 = vadd.f32 %v1714_v3, %v3631_v8  ;;  %v1879_v29 = vadd.f32 0.5, %v1863_v36 }
 0x2c4   : > { %v2477_v31 = vpop.eup %2476  ;;  %v1891_v59 = vadd.f32 0.5, %v1875_v60  ;;  %v1898_v37 = vmul.f32 %v2475_v26, %v1818_v30  ;;  %2496 = vtanh.f32 %v1703_v9  ;;  %v1804_v39 = vmul.f32 0.5, %v3669_v45 }
 0x2c5   : > { %v2479_v16 = vpop.eup %2478  ;;  %2498 = vtanh.f32 %v1781_v13  ;;  %v1757_v63 = vadd.f32 %v3663_v42, %v3653_v55  ;;  %v1761_v6 = vadd.f32 %v3673_v46, %v3684_v53  ;;  %v1880_v11 = vadd.f32 0.5, %v1864_v51 }
 0x2c6   : > { %v2481_v27 = vpop.eup %2480  ;;  %v3727_v7 = vmul.f32 %v2477_v31, %v1891_v59  ;;  %2500 = vtanh.f32 %v1898_v37  ;;  %v1876_v0 = vmul.f32 0.5, %v2479_v16  ;;  %v1881_v32 = vadd.f32 0.5, %v1865_v38 }
 0x2c7   : > { %v2483_v49 = vpop.eup %2482  ;;  %2502 = vtanh.f32 %v1707_v54  ;;  %v1866_v23 = vmul.f32 0.5, %v3700_v22  ;;  %v1805_v45 = vmul.f32 0.5, %v3675_v56  ;;  %v1763_v55 = vadd.f32 %v3678_v62, %v3684_v53 }
 0x2c8   : > { %v2485_v25 = vpop.eup %2484  ;;  %v1892_v41 = vadd.f32 0.5, %v1876_v0  ;;  %v1899_v57 = vmul.f32 %v2483_v49, %v1819_v24  ;;  %2504 = vtanh.f32 %v1709_v40  ;;  %v1820_v52 = vadd.f32 0.5, %v1804_v39 }
 0x2c9   : > { %v2487_v18 = vpop.eup %2486  ;;  %2506 = vtanh.f32 %v1713_v48  ;;  %v1806_v34 = vmul.f32 0.5, %v3682_v21  ;;  %v1807_v3 = vmul.f32 0.5, %v3690_v61  ;;  %v1808_v22 = vmul.f32 0.5, %v3696_v44 }
 0x2ca   : > { %v2489_v20 = vpop.eup %2488  ;;  %2508 = vtanh.f32 %v1899_v57  ;;  %v1927_v14 = vmul.f32 %v2487_v18, %v1879_v29  ;;  %v3738_v8 = vmul.f32 %v2481_v27, %v1892_v41  ;;  %v1882_v56 = vadd.f32 0.5, %v1866_v23 }
 0x2cb   : > { %v2491_v43 = vpop.eup %2490  ;;  %2510 = vtanh.f32 %v1715_v28  ;;  %v1867_v1 = vmul.f32 0.5, %v3705_v47  ;;  %v1821_v50 = vadd.f32 0.5, %v1805_v45  ;;  %v1822_v12 = vadd.f32 0.5, %v1806_v34 }
 0x2cc   : > { %v2493_v4 = vpop.eup %2492  ;;  %2512 = vtanh.f32 %v1755_v15  ;;  %v1928_v42 = vmul.f32 %v2491_v43, %v1880_v11  ;;  %v1823_v60 = vadd.f32 0.5, %v1807_v3  ;;  %v1824_v31 = vadd.f32 0.5, %v1808_v22  ;;  %v1948_v3 = vpop.permute.xlu1 %1947 }
 0x2cd   : > { %v2495_v46 = vpop.eup %2494  ;;  %2514 = vtanh.f32 %v1757_v63  ;;  %v1929_v19 = vmul.f32 %v2493_v4, %v1881_v32  ;;  %v1883_v59 = vadd.f32 0.5, %v1867_v1  ;;  %v1868_v49 = vmul.f32 0.5, %v3709_v5 }
 0x2ce   : > { %v2497_v2 = vpop.eup %2496  ;;  %2516 = vtanh.f32 %v1761_v6  ;;  %v1877_v33 = vmul.f32 0.5, %v2495_v46 }
 0x2cf   : > { %v2499_v17 = vpop.eup %2498  ;;  %v1900_v9 = vmul.f32 %v2497_v2, %v1820_v52  ;;  %v2175_v62 = vpack.c.bf16 %v1929_v19, %v1927_v14  ;;  %2518 = vtanh.f32 %v1763_v55  ;;  %v1884_v57 = vadd.f32 0.5, %v1868_v49  ;;  %v1943_v2 = vld [vmem:[%s3811_s7] sm:$0x7] }
 0x2d0   : > { %v2501_v53 = vpop.eup %2500  ;;  %v1893_v10 = vadd.f32 0.5, %v1877_v33  ;;  %v1878_v21 = vmul.f32 0.5, %v2499_v17 }
 0x2d1   : > { %v2503_v13 = vpop.eup %2502  ;;  %2520 = vtanh.f32 %v1900_v9  ;;  %v1930_v30 = vmul.f32 %v2501_v53, %v1882_v56 }
 0x2d2   : > { %v2505_v61 = vpop.eup %2504  ;;  %v1941_v44 = vmul.f32 %v2485_v25, %v1893_v10  ;;  %v1894_v26 = vadd.f32 0.5, %v1878_v21  ;;  %v1901_v36 = vmul.f32 %v2503_v13, %v1821_v50 }
 0x2d3   : > { %v2507_v54 = vpop.eup %2506  ;;  %v1902_v47 = vmul.f32 %v2505_v61, %v1822_v12  ;;  %v2173_v37 = vpack.c.bf16 %v1930_v30, %v1928_v42 }
 0x2d4   : > { %v2509_v40 = vpop.eup %2508  ;;  %2522 = vtanh.f32 %v1901_v36  ;;  %v1903_v16 = vmul.f32 %v2507_v54, %v1823_v60  ;;  %v1942_v24 = vmul.f32 %v2489_v20, %v1894_v26  ;;  %v2187_v48 = vpack.c.bf16 %v1941_v44, %v3727_v7 }
 0x2d5   : > { %v2511_v27 = vpop.eup %2510  ;;  %2524 = vtanh.f32 %v1902_v47  ;;  %2174 = vmatprep.subr.bf16.mxu1 %v2173_v37  ;;  %v1931_v51 = vmul.f32 %v2509_v40, %v1883_v59 }
 0x2d6   : > { %v2513_v0 = vpop.eup %2512  ;;  %2526 = vtanh.f32 %v1903_v16  ;;  %v1904_v38 = vmul.f32 %v2511_v27, %v1824_v31  ;;  %2176 = vmatpush1.bf16.msra.mxu1 %v2175_v62  ;;  %v2185_v15 = vpack.c.bf16 %v1942_v24, %v3738_v8 }
 0x2d7   : > { %v2515_v28 = vpop.eup %2514  ;;  %v1869_v29 = vmul.f32 0.5, %v2513_v0 }
 0x2d8   : > { %v2517_v25 = vpop.eup %2516  ;;  %2528 = vtanh.f32 %v1904_v38  ;;  %v1870_v18 = vmul.f32 0.5, %v2515_v28 }
 0x2d9   : > { %v2519_v41 = vpop.eup %2518  ;;  %v1871_v39 = vmul.f32 0.5, %v2517_v25  ;;  %v1885_v6 = vadd.f32 0.5, %v1869_v29 }
 0x2da   : > { %v1872_v20 = vmul.f32 0.5, %v2519_v41  ;;  %v1886_v14 = vadd.f32 0.5, %v1870_v18 }
 0x2db   : > { %v2521_v7 = vpop.eup %2520  ;;  %v1887_v43 = vadd.f32 0.5, %v1871_v39 }
 0x2dc   : > { %v1932_v63 = vmul.f32 %v2521_v7, %v1884_v57  ;;  %v1888_v8 = vadd.f32 0.5, %v1872_v20 }
 0x2de   : > { %v2523_v11 = vpop.eup %2522 }
 0x2df   : > { %v2525_v5 = vpop.eup %2524  ;;  %v1933_v32 = vmul.f32 %v2523_v11, %v1885_v6 }
 0x2e0   : > { %v2527_v23 = vpop.eup %2526  ;;  %v1934_v4 = vmul.f32 %v2525_v5, %v1886_v14 }
 0x2e1   : > { %v2179_v45 = vpack.c.bf16 %v1933_v32, %v1931_v51  ;;  %v1935_v55 = vmul.f32 %v2527_v23, %v1887_v43 }
 0x2e2   : > { %v2529_v42 = vpop.eup %2528  ;;  %v2177_v46 = vpack.c.bf16 %v1934_v4, %v1932_v63 }
 0x2e3   : > { %v1936_v52 = vmul.f32 %v2529_v42, %v1888_v8  ;;  %v2183_v34 = vpack.c.bf16 %v3718_v35, %v1935_v55 }
 0x2e4   : > { %2178 = vmatprep.subr.bf16.mxu1 %v2177_v46 }
 0x2e5   : > { %2180 = vmatpush1.bf16.msra.mxu1 %v2179_v45  ;;  %v2181_v19 = vpack.c.bf16 %v3722_v58, %v1936_v52 }
 0x2e7   : > { %2182 = vmatprep.subr.bf16.mxu1 %v2181_v19 }
 0x2e9   : > { %2184 = vmatpush1.bf16.msra.mxu1 %v2183_v34 }
 0x2ea   : > { %2186 = vmatprep.subr.bf16.mxu1 %v2185_v15 }
 0x2ed   : > { %2188 = vmatpush1.bf16.msra.mxu1 %v2187_v48 }
 0x2f0   : > { %2150 = vmatmul.mubr.msk.f32.vlgmr.msra.gmra.mrb[22].mxu1 %vm1501_vm0, %v1943_v2 }
 0x3c3   : > { %v2019_v35 = vpop.f32.mrb[22].mxu1 }
 0x3c4   : > { %v2020_v22 = vadd.f32 %v2019_v35, %v1948_v3  ;;  %v2021_v33 = vpop.f32.mrb[23].mxu1 }
 0x3c5   : > { %v2022_v58 = vadd.f32 %v2021_v33, %v1948_v3 }
 0x3c7   : > { %v2026_v17 = vcombine.low %v2020_v22, %v2022_v58 }
 0x3c9   : > { %2028 = vst [vmem:[%s352_s27] sm:$0x77] %v2026_v17 }
 0x3ca   : > { %2543 = shalt.err (!%p2540_p3)
}
 0x3cb   : > { %s2544_s24 = scalar_lea.hbm %s3762_s16, 128  ;;  %s2548_s27 = scalar_lea.hbm %s3813_s9, 256 }
 0x3cc   : > { %p2545_p4 = scmp.ne.s32.totalorder %s3762_s16, %s2544_s24  ;;  %p2549_p9 = scmp.lt.u32.totalorder %s3762_s16, %s3813_s9 }
 0x3cd   : > { %p2550_p10 = scmp.lt.u32.totalorder %s2548_s27, %s2544_s24  ;;  %p2552_p12 = scmp.lt.u32.totalorder %s2544_s24, %s3762_s16 }
 0x3ce   : > { %p2546_p7 = pnand %p2545_p4, %p2687_p5 }
 0x3cf   : > { %p2551_p11 = por %p2550_p10, %p2549_p9 }
 0x3d0   : > { %p2547_p8 = pneg %p2546_p7 }
 0x3d1   : > { %p2553_p13 = por %p2552_p12, %p2551_p11 }
 0x3d3   : > { %p2554_p0 = pnand %p2553_p13, %p2547_p8 }
 0x3d5   : > { %2557 = shalt.err (!%p2554_p0)
}
 0x3d6   : > { %2197 = dma.vmem_to_hbm [thread:$0]  (%p2687_p5), %s3764_s29, 128, %s3762_s16, %s2030_s17  }
 0x3d7 PF: > { %p2203_p1 = scmp.ge.s32.totalorder %s2592_s12, 2  ;;  %s2056_s21 = sand.u32 1, %s2580_s30  }
 0x3d8   : > { %s2057_s13 = scalar_lea.sflag [#allocation3], %s2056_s21 }
 0x3d9   : > { %p2200_p2 = pnand %p2203_p1, %p2691_p6 }
 0x3db   : > { %2575 = dma.done.wait (!%p2200_p2), %s2057_s13, 128  }
 0x3dc   : > { %2577 = vsyncadd (!%p2200_p2), %s2057_s13, 4294967168  ;;  %p19_p3 = scmp.ge.s32.totalorder %s2674_s15, 4   ;;  %s3865_s30 = smov %s2584_s10 }
 0x3dd   : > { %s3866_s10 = smov %s2588_s11  ;;  %s3867_s11 = smov %s2685_s18 }
 0x3de   : > { %s3868_s12 = smov %s2674_s15  ;;  %21 = sbr.rel (!%p19_p3) target bundleno = 3 (0x3), region = 97 }
 0x3e5   :  { %2062 = vsyncpa [#allocation3], 1 }
 0x3e6   :  { %2064 = vsyncpa [#allocation3 + $0x1], 1 }

</bundles_post_ra>
